<compile_context>
chip_gen: v7x
topology: tpu7x:2x2x1
jax: 0.10.0
libtpu: 0.0.40
codegen_flags: <defaults>
</compile_context>

<pallas_src>
import functools

import jax
import jax.numpy as jnp
from jax.experimental import pallas as pl
from jax.experimental.pallas import tpu as pltpu


# ----------------------------------------------------------------------------
# Fused Pallas kernel: n_layers LSTM + fc + sigmoid epilogue
# ----------------------------------------------------------------------------
def _fused_lstm_kernel(n_layers, x_ref, *refs):
    """Everything resident in VMEM; single invocation, no grid.

    refs layout (after x_ref):
      [w_ih_0, w_hh_0, b_0, ..., w_ih_{L-1}, w_hh_{L-1}, b_{L-1},
       h0, c0, w_fc, b_fc,                # remaining inputs
       out, hn, cn,                       # outputs
       pre_scr, y_scr]                    # VMEM scratch
    """
    w_refs = refs[:3 * n_layers]
    h0_ref, c0_ref, w_fc_ref, b_fc_ref = refs[3 * n_layers:3 * n_layers + 4]
    out_ref, hn_ref, cn_ref = refs[3 * n_layers + 4:3 * n_layers + 7]
    pre_scr, y_scr = refs[3 * n_layers + 7:3 * n_layers + 9]

    S, Bp, E = x_ref.shape
    H = hn_ref.shape[-1]
    # Full unroll for short fixed trip counts; partial unroll (4) otherwise to
    # keep live ranges under 64 vregs while still giving the scheduler slack.
    unroll = S if S <= 16 else 4

    # layer input for layer 0: flattened embeddings (S*Bp, E), bf16 operands.
    x2d = x_ref[...].reshape(S * Bp, E)

    h_fin = None
    for layer in range(n_layers):
        w_ih_ref = w_refs[3 * layer + 0]
        w_hh_ref = w_refs[3 * layer + 1]
        b_ref = w_refs[3 * layer + 2]
        last_layer = (layer == n_layers - 1)

        # Hoisted input projection: one big MXU GEMM for all timesteps
        # (bf16 operands, f32 accumulation), bias folded in once.
        pre = jnp.dot(x2d, w_ih_ref[...],
                      preferred_element_type=jnp.float32) + b_ref[...]
        pre_scr[...] = pre.reshape(S, Bp, 4 * H)

        # Loop-invariant weight load hoisted off the serial critical path.
        w_hh = w_hh_ref[...]

        def step(t, carry, w_hh=w_hh, last_layer=last_layer):
            h_prev, c_prev = carry
            # Only one small MXU matmul on the serial path (bf16 x bf16 -> f32).
            gates = pre_scr[t] + jnp.dot(h_prev.astype(w_hh.dtype), w_hh,
                                         preferred_element_type=jnp.float32)
            # Gate order (i, f, o, g): one sigmoid over 3H, one tanh over H.
            sig = jax.nn.sigmoid(gates[:, :3 * H])
            g_g = jnp.tanh(gates[:, 3 * H:])
            i_g = sig[:, 0 * H:1 * H]
            f_g = sig[:, 1 * H:2 * H]
            o_g = sig[:, 2 * H:3 * H]
            c_new = f_g * c_prev + i_g * g_g
            h_new = o_g * jnp.tanh(c_new)
            if not last_layer:
                # Next-layer input, VMEM only; skipped entirely for the last
                # layer (its sequence outputs are never consumed).
                y_scr[t] = h_new.astype(y_scr.dtype)
            return (h_new, c_new)

        h_fin, c_fin = jax.lax.fori_loop(
            0, S, step, (h0_ref[layer], c0_ref[layer]), unroll=unroll)

        # Final states written once per layer (not every timestep).
        hn_ref[layer] = h_fin
        cn_ref[layer] = c_fin

        if not last_layer:
            # Intermediate activations stay in VMEM (never round-trip HBM).
            # TODO(synk): nn.LSTM inter-layer dropout (train mode) not implemented.
            x2d = y_scr[...].reshape(S * Bp, H)

    # Fused fc + sigmoid epilogue on the last timestep, last fc column only.
    logits = jnp.dot(h_fin, w_fc_ref[...],
                     preferred_element_type=jnp.float32) + b_fc_ref[...]
    out_ref[...] = jax.nn.sigmoid(logits).astype(out_ref.dtype)


# ----------------------------------------------------------------------------
# Wrappers
# ----------------------------------------------------------------------------
def _vmem_residency_bytes(S, Bp, E, H, L, O):
    b = S * Bp * E * 2                               # x (bf16)
    for layer in range(L):
        in_dim = E if layer == 0 else H
        b += in_dim * 4 * H * 2                      # w_ih (bf16)
        b += H * 4 * H * 2                           # w_hh (bf16)
        b += 4 * H * 4                               # fused bias (f32)
    b += 2 * L * Bp * H * 4                          # h0, c0
    b += H * O * 4 + O * 4                           # fc weight/bias
    b += S * Bp * 4 * H * 4                          # pre_scr (f32)
    b += S * Bp * H * 2                              # y_scr (bf16)
    b += Bp * O * 4 + 2 * L * Bp * H * 4             # outputs
    return b


def run_fused_lstm(x_seq, w_ih, w_hh, b, h0, c0, w_fc_t, b_fc):
    """x_seq: (S, Bp, E) time-major bf16.
    Returns (out (Bp, O), h_n (L, Bp, H), c_n (L, Bp, H))."""
    S, Bp, E = x_seq.shape
    L, _, H = h0.shape
    O = w_fc_t.shape[1]

    flat_weights = []
    for layer in range(L):
        flat_weights += [w_ih[layer], w_hh[layer], b[layer]]

    n_inputs = 1 + 3 * L + 4
    vmem = pl.BlockSpec(memory_space=pltpu.MemorySpace.VMEM)

    # Explicit scoped-VMEM budget: 2x residency + padding slack, clamped so we
    # never ask for more than the smallest physical VMEM (v7x: 64 MiB).
    resident = _vmem_residency_bytes(S, Bp, E, H, L, O)
    vmem_limit = min(64 << 20, max(16 << 20, 2 * resident + (4 << 20)))

    return pl.pallas_call(
        functools.partial(_fused_lstm_kernel, L),
        out_shape=(jax.ShapeDtypeStruct((Bp, O), jnp.float32),
                   jax.ShapeDtypeStruct((L, Bp, H), jnp.float32),
                   jax.ShapeDtypeStruct((L, Bp, H), jnp.float32)),
        in_specs=[vmem] * n_inputs,
        out_specs=(vmem, vmem, vmem),
        scratch_shapes=[
            pltpu.VMEM((S, Bp, 4 * H), jnp.float32),    # precomputed input gates
            pltpu.VMEM((S, Bp, H), jnp.bfloat16),       # layer output sequence
        ],
        compiler_params=pltpu.CompilerParams(vmem_limit_bytes=vmem_limit),
    )(x_seq, *flat_weights, h0, c0, w_fc_t, b_fc)


@jax.jit
def lstm_forward(tokens, hidden, params):
    """Mirrors LSTM.forward(x, hidden) from the PyTorch module (eval mode)."""
    h0_all, c0_all = hidden                     # each (layers, B, H)
    B, S = tokens.shape

    # Embedding gather directly in time-major: (S, B, E); bf16 matmul operands.
    x = jnp.take(params["embedding"], tokens.T, axis=0).astype(jnp.bfloat16)

    # Pad batch to a multiple of 8 sublanes (VPU/MXU row occupancy).
    Bp = ((B + 7) // 8) * 8
    pad = Bp - B
    if pad:
        x = jnp.pad(x, ((0, 0), (0, pad), (0, 0)))
        h0 = jnp.pad(h0_all, ((0, 0), (0, pad), (0, 0)))
        c0 = jnp.pad(c0_all, ((0, 0), (0, pad), (0, 0)))
    else:
        h0, c0 = h0_all, c0_all

    # Only fc column O-1 is ever consumed (x.view(B,-1)[:, -1] with t=S-1):
    # slice the classifier before the kernel.
    w_fc_last = params["w_fc_t"][:, -1:]
    b_fc_last = params["b_fc"][:, -1:]

    out, hn, cn = run_fused_lstm(
        x, params["w_ih"], params["w_hh"], params["b"],
        h0, c0, w_fc_last, b_fc_last)

    out = out[:B]                 # (B, 1) = sigmoid(fc(h_{S-1}))[:, -1:], drop = identity (eval)
    h_n = hn[:, :B]
    c_n = cn[:, :B]

    result = out[:, 0]            # == PyTorch x.view(B, -1)[:, -1]
    return result, (h_n, c_n)


# ----------------------------------------------------------------------------
# Deterministic parameter init (PyTorch-style uniform(-1/sqrt(H), 1/sqrt(H)))
#
# Gate storage convention: the 4H axis of w_ih / w_hh / b is ordered
# (i, f, o, g).  When importing PyTorch nn.LSTM weights (ordered i, f, g, o),
# permute the 4H axis blocks from (i, f, g, o) -> (i, f, o, g) and transpose
# to (in, 4H) / (H, 4H).
# ----------------------------------------------------------------------------
def init_params(key, vocab_size, output_size, embedding_dim, hidden_dim, layers):
    ks = jax.random.split(key, 3 + 4 * layers)
    bound = 1.0 / jnp.sqrt(hidden_dim)
    H = hidden_dim

    params = {}
    params["embedding"] = jax.random.normal(
        ks[0], (vocab_size, embedding_dim), jnp.float32)

    w_ih, w_hh, b = [], [], []
    for layer in range(layers):
        in_dim = embedding_dim if layer == 0 else hidden_dim
        k0, k1, k2, k3 = ks[3 + 4 * layer: 3 + 4 * layer + 4]
        # stored transposed: (in, 4H) / (H, 4H); gate order (i, f, o, g).
        w_ih.append(jax.random.uniform(k0, (in_dim, 4 * H),
                                       jnp.float32, -bound, bound)
                    .astype(jnp.bfloat16))
        w_hh.append(jax.random.uniform(k1, (H, 4 * H),
                                       jnp.float32, -bound, bound)
                    .astype(jnp.bfloat16))
        b_ih = jax.random.uniform(k2, (4 * H,), jnp.float32, -bound, bound)
        b_hh = jax.random.uniform(k3, (4 * H,), jnp.float32, -bound, bound)
        b.append((b_ih + b_hh).reshape(1, 4 * H))     # f32 (gate math stays f32)
    params["w_ih"] = w_ih
    params["w_hh"] = w_hh
    params["b"] = b

    params["w_fc_t"] = jax.random.uniform(
        ks[1], (hidden_dim, output_size), jnp.float32, -bound, bound)
    params["b_fc"] = jax.random.uniform(
        ks[2], (1, output_size), jnp.float32, -bound, bound)
    return params


def init_hidden(layers, batch_size, hidden_dim):
    return (jnp.zeros((layers, batch_size, hidden_dim), jnp.float32),
            jnp.zeros((layers, batch_size, hidden_dim), jnp.float32))


# ----------------------------------------------------------------------------
if __name__ == "__main__":
    vocab_size = 100
    output_size = 1
    embedding_dim = 32
    hidden_dim = 32
    layers = 2
    batch = 2
    seq = 8

    key = jax.random.PRNGKey(0)
    k_params, k_tokens = jax.random.split(key)

    params = init_params(k_params, vocab_size, output_size,
                         embedding_dim, hidden_dim, layers)
    tokens = jax.random.randint(k_tokens, (batch, seq), 0, vocab_size,
                                dtype=jnp.int32)
    hidden = init_hidden(layers, batch, hidden_dim)

    out, (h_n, c_n) = lstm_forward(tokens, hidden, params)
    jax.block_until_ready((out, h_n, c_n))

    assert out.shape == (batch,)
    assert h_n.shape == (layers, batch, hidden_dim)
    assert c_n.shape == (layers, batch, hidden_dim)
    assert bool(jnp.all(jnp.isfinite(out)))
    assert bool(jnp.all(jnp.isfinite(h_n))) and bool(jnp.all(jnp.isfinite(c_n)))
    print("KERNEL_OK")
</pallas_src>

<mosaic_0001>
module attributes {stable_mosaic.version = 11 : i64} {
  func.func @_fused_lstm_kernel(%arg0: memref<8x8x32xbf16, #tpu.memory_space<vmem>>, %arg1: memref<32x128xbf16, #tpu.memory_space<vmem>>, %arg2: memref<32x128xbf16, #tpu.memory_space<vmem>>, %arg3: memref<1x128xf32, #tpu.memory_space<vmem>>, %arg4: memref<32x128xbf16, #tpu.memory_space<vmem>>, %arg5: memref<32x128xbf16, #tpu.memory_space<vmem>>, %arg6: memref<1x128xf32, #tpu.memory_space<vmem>>, %arg7: memref<2x8x32xf32, #tpu.memory_space<vmem>>, %arg8: memref<2x8x32xf32, #tpu.memory_space<vmem>>, %arg9: memref<32x1xf32, #tpu.memory_space<vmem>>, %arg10: memref<1x1xf32, #tpu.memory_space<vmem>>, %arg11: memref<8x1xf32, #tpu.memory_space<vmem>>, %arg12: memref<2x8x32xf32, #tpu.memory_space<vmem>>, %arg13: memref<2x8x32xf32, #tpu.memory_space<vmem>>, %arg14: memref<8x8x128xf32, #tpu.memory_space<vmem>>, %arg15: memref<8x8x32xbf16, #tpu.memory_space<vmem>>) attributes {dimension_semantics = [], scalar_prefetch = 0 : i64, scratch_operands = 2 : i64, tpu.core_type = #tpu.core_type<tc>} {
    %c0 = arith.constant 0 : index
    %c0_0 = arith.constant 0 : index
    %c0_1 = arith.constant 0 : index
    %0 = vector.load %arg0[%c0, %c0_0, %c0_1] : memref<8x8x32xbf16, #tpu.memory_space<vmem>>, vector<8x8x32xbf16>
    %1 = vector.shape_cast %0 : vector<8x8x32xbf16> to vector<64x32xbf16>
    %c0_2 = arith.constant 0 : index
    %c0_3 = arith.constant 0 : index
    %2 = vector.load %arg1[%c0_2, %c0_3] : memref<32x128xbf16, #tpu.memory_space<vmem>>, vector<32x128xbf16>
    %cst = arith.constant dense<0.000000e+00> : vector<64x128xf32>
    %3 = tpu.matmul %1, %2, %cst {dimension_numbers = #tpu.dot_dimension_numbers<[1], [0], [0], [1], [0, 0, 1, 1], [], []>} : vector<64x32xbf16>, vector<32x128xbf16>, vector<64x128xf32> -> vector<64x128xf32>
    %c0_4 = arith.constant 0 : index
    %c0_5 = arith.constant 0 : index
    %4 = vector.load %arg3[%c0_4, %c0_5] : memref<1x128xf32, #tpu.memory_space<vmem>>, vector<1x128xf32>
    %5 = vector.broadcast %4 : vector<1x128xf32> to vector<64x128xf32>
    %6 = arith.addf %3, %5 : vector<64x128xf32>
    %7 = vector.shape_cast %6 : vector<64x128xf32> to vector<8x8x128xf32>
    %c0_6 = arith.constant 0 : index
    %c0_7 = arith.constant 0 : index
    %c0_8 = arith.constant 0 : index
    %8 = vector.load %arg14[%c0_6, %c0_7, %c0_8] : memref<8x8x128xf32, #tpu.memory_space<vmem>>, vector<8x8x128xf32>
    tpu.vector_store %arg14[%c0_6, %c0_7, %c0_8], %7 {strides = array<i32>} : memref<8x8x128xf32, #tpu.memory_space<vmem>>, vector<8x8x128xf32>,
    %c0_9 = arith.constant 0 : index
    %c0_10 = arith.constant 0 : index
    %9 = vector.load %arg2[%c0_9, %c0_10] : memref<32x128xbf16, #tpu.memory_space<vmem>>, vector<32x128xbf16>
    %c0_11 = arith.constant 0 : index
    %c0_12 = arith.constant 0 : index
    %c0_13 = arith.constant 0 : index
    %10 = vector.load %arg7[%c0_11, %c0_12, %c0_13] : memref<2x8x32xf32, #tpu.memory_space<vmem>>, vector<1x8x32xf32>
    %11 = vector.shape_cast %10 : vector<1x8x32xf32> to vector<8x32xf32>
    %c0_14 = arith.constant 0 : index
    %c0_15 = arith.constant 0 : index
    %c0_16 = arith.constant 0 : index
    %12 = vector.load %arg8[%c0_14, %c0_15, %c0_16] : memref<2x8x32xf32, #tpu.memory_space<vmem>>, vector<1x8x32xf32>
    %13 = vector.shape_cast %12 : vector<1x8x32xf32> to vector<8x32xf32>
    %c0_i32 = arith.constant 0 : i32
    %14 = arith.index_cast %c0_i32 : i32 to index
    %c0_17 = arith.constant 0 : index
    %c0_18 = arith.constant 0 : index
    %15 = vector.load %arg14[%14, %c0_17, %c0_18] : memref<8x8x128xf32, #tpu.memory_space<vmem>>, vector<1x8x128xf32>
    %16 = vector.shape_cast %15 : vector<1x8x128xf32> to vector<8x128xf32>
    %17 = arith.truncf %11 : vector<8x32xf32> to vector<8x32xbf16>
    %cst_19 = arith.constant dense<0.000000e+00> : vector<8x128xf32>
    %18 = tpu.matmul %17, %9, %cst_19 {dimension_numbers = #tpu.dot_dimension_numbers<[1], [0], [0], [1], [0, 0, 1, 1], [], []>} : vector<8x32xbf16>, vector<32x128xbf16>, vector<8x128xf32> -> vector<8x128xf32>
    %19 = arith.addf %16, %18 : vector<8x128xf32>
    %20 = vector.extract_strided_slice %19 {offsets = [0, 0], sizes = [8, 96], strides = [1, 1]} : vector<8x128xf32> to vector<8x96xf32>
    %21 = arith.negf %20 : vector<8x96xf32>
    %22 = math.exp %21 : vector<8x96xf32>
    %cst_20 = arith.constant 1.000000e+00 : f32
    %23 = vector.broadcast %cst_20 : f32 to vector<8x96xf32>
    %24 = arith.addf %23, %22 : vector<8x96xf32>
    %25 = arith.divf %23, %24 : vector<8x96xf32>
    %26 = vector.extract_strided_slice %19 {offsets = [0, 96], sizes = [8, 32], strides = [1, 1]} : vector<8x128xf32> to vector<8x32xf32>
    %27 = math.tanh %26 : vector<8x32xf32>
    %28 = vector.extract_strided_slice %25 {offsets = [0, 0], sizes = [8, 32], strides = [1, 1]} : vector<8x96xf32> to vector<8x32xf32>
    %29 = vector.extract_strided_slice %25 {offsets = [0, 32], sizes = [8, 32], strides = [1, 1]} : vector<8x96xf32> to vector<8x32xf32>
    %30 = vector.extract_strided_slice %25 {offsets = [0, 64], sizes = [8, 32], strides = [1, 1]} : vector<8x96xf32> to vector<8x32xf32>
    %31 = arith.mulf %29, %13 : vector<8x32xf32>
    %32 = arith.mulf %28, %27 : vector<8x32xf32>
    %33 = arith.addf %31, %32 : vector<8x32xf32>
    %34 = math.tanh %33 : vector<8x32xf32>
    %35 = arith.mulf %30, %34 : vector<8x32xf32>
    %36 = arith.truncf %35 : vector<8x32xf32> to vector<8x32xbf16>
    %37 = arith.index_cast %c0_i32 : i32 to index
    %c0_21 = arith.constant 0 : index
    %c0_22 = arith.constant 0 : index
    %38 = vector.load %arg15[%37, %c0_21, %c0_22] : memref<8x8x32xbf16, #tpu.memory_space<vmem>>, vector<1x8x32xbf16>
    %39 = vector.shape_cast %38 : vector<1x8x32xbf16> to vector<8x32xbf16>
    %40 = vector.shape_cast %36 : vector<8x32xbf16> to vector<1x8x32xbf16>
    tpu.vector_store %arg15[%37, %c0_21, %c0_22], %40 {strides = array<i32>} : memref<8x8x32xbf16, #tpu.memory_space<vmem>>, vector<1x8x32xbf16>,
    %c1_i32 = arith.constant 1 : i32
    %41 = arith.index_cast %c1_i32 : i32 to index
    %c0_23 = arith.constant 0 : index
    %c0_24 = arith.constant 0 : index
    %42 = vector.load %arg14[%41, %c0_23, %c0_24] : memref<8x8x128xf32, #tpu.memory_space<vmem>>, vector<1x8x128xf32>
    %43 = vector.shape_cast %42 : vector<1x8x128xf32> to vector<8x128xf32>
    %44 = arith.truncf %35 : vector<8x32xf32> to vector<8x32xbf16>
    %cst_25 = arith.constant dense<0.000000e+00> : vector<8x128xf32>
    %45 = tpu.matmul %44, %9, %cst_25 {dimension_numbers = #tpu.dot_dimension_numbers<[1], [0], [0], [1], [0, 0, 1, 1], [], []>} : vector<8x32xbf16>, vector<32x128xbf16>, vector<8x128xf32> -> vector<8x128xf32>
    %46 = arith.addf %43, %45 : vector<8x128xf32>
    %47 = vector.extract_strided_slice %46 {offsets = [0, 0], sizes = [8, 96], strides = [1, 1]} : vector<8x128xf32> to vector<8x96xf32>
    %48 = arith.negf %47 : vector<8x96xf32>
    %49 = math.exp %48 : vector<8x96xf32>
    %cst_26 = arith.constant 1.000000e+00 : f32
    %50 = vector.broadcast %cst_26 : f32 to vector<8x96xf32>
    %51 = arith.addf %50, %49 : vector<8x96xf32>
    %52 = arith.divf %50, %51 : vector<8x96xf32>
    %53 = vector.extract_strided_slice %46 {offsets = [0, 96], sizes = [8, 32], strides = [1, 1]} : vector<8x128xf32> to vector<8x32xf32>
    %54 = math.tanh %53 : vector<8x32xf32>
    %55 = vector.extract_strided_slice %52 {offsets = [0, 0], sizes = [8, 32], strides = [1, 1]} : vector<8x96xf32> to vector<8x32xf32>
    %56 = vector.extract_strided_slice %52 {offsets = [0, 32], sizes = [8, 32], strides = [1, 1]} : vector<8x96xf32> to vector<8x32xf32>
    %57 = vector.extract_strided_slice %52 {offsets = [0, 64], sizes = [8, 32], strides = [1, 1]} : vector<8x96xf32> to vector<8x32xf32>
    %58 = arith.mulf %56, %33 : vector<8x32xf32>
    %59 = arith.mulf %55, %54 : vector<8x32xf32>
    %60 = arith.addf %58, %59 : vector<8x32xf32>
    %61 = math.tanh %60 : vector<8x32xf32>
    %62 = arith.mulf %57, %61 : vector<8x32xf32>
    %63 = arith.truncf %62 : vector<8x32xf32> to vector<8x32xbf16>
    %64 = arith.index_cast %c1_i32 : i32 to index
    %c0_27 = arith.constant 0 : index
    %c0_28 = arith.constant 0 : index
    %65 = vector.load %arg15[%64, %c0_27, %c0_28] : memref<8x8x32xbf16, #tpu.memory_space<vmem>>, vector<1x8x32xbf16>
    %66 = vector.shape_cast %65 : vector<1x8x32xbf16> to vector<8x32xbf16>
    %67 = vector.shape_cast %63 : vector<8x32xbf16> to vector<1x8x32xbf16>
    tpu.vector_store %arg15[%64, %c0_27, %c0_28], %67 {strides = array<i32>} : memref<8x8x32xbf16, #tpu.memory_space<vmem>>, vector<1x8x32xbf16>,
    %c2_i32 = arith.constant 2 : i32
    %68 = arith.index_cast %c2_i32 : i32 to index
    %c0_29 = arith.constant 0 : index
    %c0_30 = arith.constant 0 : index
    %69 = vector.load %arg14[%68, %c0_29, %c0_30] : memref<8x8x128xf32, #tpu.memory_space<vmem>>, vector<1x8x128xf32>
    %70 = vector.shape_cast %69 : vector<1x8x128xf32> to vector<8x128xf32>
    %71 = arith.truncf %62 : vector<8x32xf32> to vector<8x32xbf16>
    %cst_31 = arith.constant dense<0.000000e+00> : vector<8x128xf32>
    %72 = tpu.matmul %71, %9, %cst_31 {dimension_numbers = #tpu.dot_dimension_numbers<[1], [0], [0], [1], [0, 0, 1, 1], [], []>} : vector<8x32xbf16>, vector<32x128xbf16>, vector<8x128xf32> -> vector<8x128xf32>
    %73 = arith.addf %70, %72 : vector<8x128xf32>
    %74 = vector.extract_strided_slice %73 {offsets = [0, 0], sizes = [8, 96], strides = [1, 1]} : vector<8x128xf32> to vector<8x96xf32>
    %75 = arith.negf %74 : vector<8x96xf32>
    %76 = math.exp %75 : vector<8x96xf32>
    %cst_32 = arith.constant 1.000000e+00 : f32
    %77 = vector.broadcast %cst_32 : f32 to vector<8x96xf32>
    %78 = arith.addf %77, %76 : vector<8x96xf32>
    %79 = arith.divf %77, %78 : vector<8x96xf32>
    %80 = vector.extract_strided_slice %73 {offsets = [0, 96], sizes = [8, 32], strides = [1, 1]} : vector<8x128xf32> to vector<8x32xf32>
    %81 = math.tanh %80 : vector<8x32xf32>
    %82 = vector.extract_strided_slice %79 {offsets = [0, 0], sizes = [8, 32], strides = [1, 1]} : vector<8x96xf32> to vector<8x32xf32>
    %83 = vector.extract_strided_slice %79 {offsets = [0, 32], sizes = [8, 32], strides = [1, 1]} : vector<8x96xf32> to vector<8x32xf32>
    %84 = vector.extract_strided_slice %79 {offsets = [0, 64], sizes = [8, 32], strides = [1, 1]} : vector<8x96xf32> to vector<8x32xf32>
    %85 = arith.mulf %83, %60 : vector<8x32xf32>
    %86 = arith.mulf %82, %81 : vector<8x32xf32>
    %87 = arith.addf %85, %86 : vector<8x32xf32>
    %88 = math.tanh %87 : vector<8x32xf32>
    %89 = arith.mulf %84, %88 : vector<8x32xf32>
    %90 = arith.truncf %89 : vector<8x32xf32> to vector<8x32xbf16>
    %91 = arith.index_cast %c2_i32 : i32 to index
    %c0_33 = arith.constant 0 : index
    %c0_34 = arith.constant 0 : index
    %92 = vector.load %arg15[%91, %c0_33, %c0_34] : memref<8x8x32xbf16, #tpu.memory_space<vmem>>, vector<1x8x32xbf16>
    %93 = vector.shape_cast %92 : vector<1x8x32xbf16> to vector<8x32xbf16>
    %94 = vector.shape_cast %90 : vector<8x32xbf16> to vector<1x8x32xbf16>
    tpu.vector_store %arg15[%91, %c0_33, %c0_34], %94 {strides = array<i32>} : memref<8x8x32xbf16, #tpu.memory_space<vmem>>, vector<1x8x32xbf16>,
    %c3_i32 = arith.constant 3 : i32
    %95 = arith.index_cast %c3_i32 : i32 to index
    %c0_35 = arith.constant 0 : index
    %c0_36 = arith.constant 0 : index
    %96 = vector.load %arg14[%95, %c0_35, %c0_36] : memref<8x8x128xf32, #tpu.memory_space<vmem>>, vector<1x8x128xf32>
    %97 = vector.shape_cast %96 : vector<1x8x128xf32> to vector<8x128xf32>
    %98 = arith.truncf %89 : vector<8x32xf32> to vector<8x32xbf16>
    %cst_37 = arith.constant dense<0.000000e+00> : vector<8x128xf32>
    %99 = tpu.matmul %98, %9, %cst_37 {dimension_numbers = #tpu.dot_dimension_numbers<[1], [0], [0], [1], [0, 0, 1, 1], [], []>} : vector<8x32xbf16>, vector<32x128xbf16>, vector<8x128xf32> -> vector<8x128xf32>
    %100 = arith.addf %97, %99 : vector<8x128xf32>
    %101 = vector.extract_strided_slice %100 {offsets = [0, 0], sizes = [8, 96], strides = [1, 1]} : vector<8x128xf32> to vector<8x96xf32>
    %102 = arith.negf %101 : vector<8x96xf32>
    %103 = math.exp %102 : vector<8x96xf32>
    %cst_38 = arith.constant 1.000000e+00 : f32
    %104 = vector.broadcast %cst_38 : f32 to vector<8x96xf32>
    %105 = arith.addf %104, %103 : vector<8x96xf32>
    %106 = arith.divf %104, %105 : vector<8x96xf32>
    %107 = vector.extract_strided_slice %100 {offsets = [0, 96], sizes = [8, 32], strides = [1, 1]} : vector<8x128xf32> to vector<8x32xf32>
    %108 = math.tanh %107 : vector<8x32xf32>
    %109 = vector.extract_strided_slice %106 {offsets = [0, 0], sizes = [8, 32], strides = [1, 1]} : vector<8x96xf32> to vector<8x32xf32>
    %110 = vector.extract_strided_slice %106 {offsets = [0, 32], sizes = [8, 32], strides = [1, 1]} : vector<8x96xf32> to vector<8x32xf32>
    %111 = vector.extract_strided_slice %106 {offsets = [0, 64], sizes = [8, 32], strides = [1, 1]} : vector<8x96xf32> to vector<8x32xf32>
    %112 = arith.mulf %110, %87 : vector<8x32xf32>
    %113 = arith.mulf %109, %108 : vector<8x32xf32>
    %114 = arith.addf %112, %113 : vector<8x32xf32>
    %115 = math.tanh %114 : vector<8x32xf32>
    %116 = arith.mulf %111, %115 : vector<8x32xf32>
    %117 = arith.truncf %116 : vector<8x32xf32> to vector<8x32xbf16>
    %118 = arith.index_cast %c3_i32 : i32 to index
    %c0_39 = arith.constant 0 : index
    %c0_40 = arith.constant 0 : index
    %119 = vector.load %arg15[%118, %c0_39, %c0_40] : memref<8x8x32xbf16, #tpu.memory_space<vmem>>, vector<1x8x32xbf16>
    %120 = vector.shape_cast %119 : vector<1x8x32xbf16> to vector<8x32xbf16>
    %121 = vector.shape_cast %117 : vector<8x32xbf16> to vector<1x8x32xbf16>
    tpu.vector_store %arg15[%118, %c0_39, %c0_40], %121 {strides = array<i32>} : memref<8x8x32xbf16, #tpu.memory_space<vmem>>, vector<1x8x32xbf16>,
    %c4_i32 = arith.constant 4 : i32
    %122 = arith.index_cast %c4_i32 : i32 to index
    %c0_41 = arith.constant 0 : index
    %c0_42 = arith.constant 0 : index
    %123 = vector.load %arg14[%122, %c0_41, %c0_42] : memref<8x8x128xf32, #tpu.memory_space<vmem>>, vector<1x8x128xf32>
    %124 = vector.shape_cast %123 : vector<1x8x128xf32> to vector<8x128xf32>
    %125 = arith.truncf %116 : vector<8x32xf32> to vector<8x32xbf16>
    %cst_43 = arith.constant dense<0.000000e+00> : vector<8x128xf32>
    %126 = tpu.matmul %125, %9, %cst_43 {dimension_numbers = #tpu.dot_dimension_numbers<[1], [0], [0], [1], [0, 0, 1, 1], [], []>} : vector<8x32xbf16>, vector<32x128xbf16>, vector<8x128xf32> -> vector<8x128xf32>
    %127 = arith.addf %124, %126 : vector<8x128xf32>
    %128 = vector.extract_strided_slice %127 {offsets = [0, 0], sizes = [8, 96], strides = [1, 1]} : vector<8x128xf32> to vector<8x96xf32>
    %129 = arith.negf %128 : vector<8x96xf32>
    %130 = math.exp %129 : vector<8x96xf32>
    %cst_44 = arith.constant 1.000000e+00 : f32
    %131 = vector.broadcast %cst_44 : f32 to vector<8x96xf32>
    %132 = arith.addf %131, %130 : vector<8x96xf32>
    %133 = arith.divf %131, %132 : vector<8x96xf32>
    %134 = vector.extract_strided_slice %127 {offsets = [0, 96], sizes = [8, 32], strides = [1, 1]} : vector<8x128xf32> to vector<8x32xf32>
    %135 = math.tanh %134 : vector<8x32xf32>
    %136 = vector.extract_strided_slice %133 {offsets = [0, 0], sizes = [8, 32], strides = [1, 1]} : vector<8x96xf32> to vector<8x32xf32>
    %137 = vector.extract_strided_slice %133 {offsets = [0, 32], sizes = [8, 32], strides = [1, 1]} : vector<8x96xf32> to vector<8x32xf32>
    %138 = vector.extract_strided_slice %133 {offsets = [0, 64], sizes = [8, 32], strides = [1, 1]} : vector<8x96xf32> to vector<8x32xf32>
    %139 = arith.mulf %137, %114 : vector<8x32xf32>
    %140 = arith.mulf %136, %135 : vector<8x32xf32>
    %141 = arith.addf %139, %140 : vector<8x32xf32>
    %142 = math.tanh %141 : vector<8x32xf32>
    %143 = arith.mulf %138, %142 : vector<8x32xf32>
    %144 = arith.truncf %143 : vector<8x32xf32> to vector<8x32xbf16>
    %145 = arith.index_cast %c4_i32 : i32 to index
    %c0_45 = arith.constant 0 : index
    %c0_46 = arith.constant 0 : index
    %146 = vector.load %arg15[%145, %c0_45, %c0_46] : memref<8x8x32xbf16, #tpu.memory_space<vmem>>, vector<1x8x32xbf16>
    %147 = vector.shape_cast %146 : vector<1x8x32xbf16> to vector<8x32xbf16>
    %148 = vector.shape_cast %144 : vector<8x32xbf16> to vector<1x8x32xbf16>
    tpu.vector_store %arg15[%145, %c0_45, %c0_46], %148 {strides = array<i32>} : memref<8x8x32xbf16, #tpu.memory_space<vmem>>, vector<1x8x32xbf16>,
    %c5_i32 = arith.constant 5 : i32
    %149 = arith.index_cast %c5_i32 : i32 to index
    %c0_47 = arith.constant 0 : index
    %c0_48 = arith.constant 0 : index
    %150 = vector.load %arg14[%149, %c0_47, %c0_48] : memref<8x8x128xf32, #tpu.memory_space<vmem>>, vector<1x8x128xf32>
    %151 = vector.shape_cast %150 : vector<1x8x128xf32> to vector<8x128xf32>
    %152 = arith.truncf %143 : vector<8x32xf32> to vector<8x32xbf16>
    %cst_49 = arith.constant dense<0.000000e+00> : vector<8x128xf32>
    %153 = tpu.matmul %152, %9, %cst_49 {dimension_numbers = #tpu.dot_dimension_numbers<[1], [0], [0], [1], [0, 0, 1, 1], [], []>} : vector<8x32xbf16>, vector<32x128xbf16>, vector<8x128xf32> -> vector<8x128xf32>
    %154 = arith.addf %151, %153 : vector<8x128xf32>
    %155 = vector.extract_strided_slice %154 {offsets = [0, 0], sizes = [8, 96], strides = [1, 1]} : vector<8x128xf32> to vector<8x96xf32>
    %156 = arith.negf %155 : vector<8x96xf32>
    %157 = math.exp %156 : vector<8x96xf32>
    %cst_50 = arith.constant 1.000000e+00 : f32
    %158 = vector.broadcast %cst_50 : f32 to vector<8x96xf32>
    %159 = arith.addf %158, %157 : vector<8x96xf32>
    %160 = arith.divf %158, %159 : vector<8x96xf32>
    %161 = vector.extract_strided_slice %154 {offsets = [0, 96], sizes = [8, 32], strides = [1, 1]} : vector<8x128xf32> to vector<8x32xf32>
    %162 = math.tanh %161 : vector<8x32xf32>
    %163 = vector.extract_strided_slice %160 {offsets = [0, 0], sizes = [8, 32], strides = [1, 1]} : vector<8x96xf32> to vector<8x32xf32>
    %164 = vector.extract_strided_slice %160 {offsets = [0, 32], sizes = [8, 32], strides = [1, 1]} : vector<8x96xf32> to vector<8x32xf32>
    %165 = vector.extract_strided_slice %160 {offsets = [0, 64], sizes = [8, 32], strides = [1, 1]} : vector<8x96xf32> to vector<8x32xf32>
    %166 = arith.mulf %164, %141 : vector<8x32xf32>
    %167 = arith.mulf %163, %162 : vector<8x32xf32>
    %168 = arith.addf %166, %167 : vector<8x32xf32>
    %169 = math.tanh %168 : vector<8x32xf32>
    %170 = arith.mulf %165, %169 : vector<8x32xf32>
    %171 = arith.truncf %170 : vector<8x32xf32> to vector<8x32xbf16>
    %172 = arith.index_cast %c5_i32 : i32 to index
    %c0_51 = arith.constant 0 : index
    %c0_52 = arith.constant 0 : index
    %173 = vector.load %arg15[%172, %c0_51, %c0_52] : memref<8x8x32xbf16, #tpu.memory_space<vmem>>, vector<1x8x32xbf16>
    %174 = vector.shape_cast %173 : vector<1x8x32xbf16> to vector<8x32xbf16>
    %175 = vector.shape_cast %171 : vector<8x32xbf16> to vector<1x8x32xbf16>
    tpu.vector_store %arg15[%172, %c0_51, %c0_52], %175 {strides = array<i32>} : memref<8x8x32xbf16, #tpu.memory_space<vmem>>, vector<1x8x32xbf16>,
    %c6_i32 = arith.constant 6 : i32
    %176 = arith.index_cast %c6_i32 : i32 to index
    %c0_53 = arith.constant 0 : index
    %c0_54 = arith.constant 0 : index
    %177 = vector.load %arg14[%176, %c0_53, %c0_54] : memref<8x8x128xf32, #tpu.memory_space<vmem>>, vector<1x8x128xf32>
    %178 = vector.shape_cast %177 : vector<1x8x128xf32> to vector<8x128xf32>
    %179 = arith.truncf %170 : vector<8x32xf32> to vector<8x32xbf16>
    %cst_55 = arith.constant dense<0.000000e+00> : vector<8x128xf32>
    %180 = tpu.matmul %179, %9, %cst_55 {dimension_numbers = #tpu.dot_dimension_numbers<[1], [0], [0], [1], [0, 0, 1, 1], [], []>} : vector<8x32xbf16>, vector<32x128xbf16>, vector<8x128xf32> -> vector<8x128xf32>
    %181 = arith.addf %178, %180 : vector<8x128xf32>
    %182 = vector.extract_strided_slice %181 {offsets = [0, 0], sizes = [8, 96], strides = [1, 1]} : vector<8x128xf32> to vector<8x96xf32>
    %183 = arith.negf %182 : vector<8x96xf32>
    %184 = math.exp %183 : vector<8x96xf32>
    %cst_56 = arith.constant 1.000000e+00 : f32
    %185 = vector.broadcast %cst_56 : f32 to vector<8x96xf32>
    %186 = arith.addf %185, %184 : vector<8x96xf32>
    %187 = arith.divf %185, %186 : vector<8x96xf32>
    %188 = vector.extract_strided_slice %181 {offsets = [0, 96], sizes = [8, 32], strides = [1, 1]} : vector<8x128xf32> to vector<8x32xf32>
    %189 = math.tanh %188 : vector<8x32xf32>
    %190 = vector.extract_strided_slice %187 {offsets = [0, 0], sizes = [8, 32], strides = [1, 1]} : vector<8x96xf32> to vector<8x32xf32>
    %191 = vector.extract_strided_slice %187 {offsets = [0, 32], sizes = [8, 32], strides = [1, 1]} : vector<8x96xf32> to vector<8x32xf32>
    %192 = vector.extract_strided_slice %187 {offsets = [0, 64], sizes = [8, 32], strides = [1, 1]} : vector<8x96xf32> to vector<8x32xf32>
    %193 = arith.mulf %191, %168 : vector<8x32xf32>
    %194 = arith.mulf %190, %189 : vector<8x32xf32>
    %195 = arith.addf %193, %194 : vector<8x32xf32>
    %196 = math.tanh %195 : vector<8x32xf32>
    %197 = arith.mulf %192, %196 : vector<8x32xf32>
    %198 = arith.truncf %197 : vector<8x32xf32> to vector<8x32xbf16>
    %199 = arith.index_cast %c6_i32 : i32 to index
    %c0_57 = arith.constant 0 : index
    %c0_58 = arith.constant 0 : index
    %200 = vector.load %arg15[%199, %c0_57, %c0_58] : memref<8x8x32xbf16, #tpu.memory_space<vmem>>, vector<1x8x32xbf16>
    %201 = vector.shape_cast %200 : vector<1x8x32xbf16> to vector<8x32xbf16>
    %202 = vector.shape_cast %198 : vector<8x32xbf16> to vector<1x8x32xbf16>
    tpu.vector_store %arg15[%199, %c0_57, %c0_58], %202 {strides = array<i32>} : memref<8x8x32xbf16, #tpu.memory_space<vmem>>, vector<1x8x32xbf16>,
    %c7_i32 = arith.constant 7 : i32
    %203 = arith.index_cast %c7_i32 : i32 to index
    %c0_59 = arith.constant 0 : index
    %c0_60 = arith.constant 0 : index
    %204 = vector.load %arg14[%203, %c0_59, %c0_60] : memref<8x8x128xf32, #tpu.memory_space<vmem>>, vector<1x8x128xf32>
    %205 = vector.shape_cast %204 : vector<1x8x128xf32> to vector<8x128xf32>
    %206 = arith.truncf %197 : vector<8x32xf32> to vector<8x32xbf16>
    %cst_61 = arith.constant dense<0.000000e+00> : vector<8x128xf32>
    %207 = tpu.matmul %206, %9, %cst_61 {dimension_numbers = #tpu.dot_dimension_numbers<[1], [0], [0], [1], [0, 0, 1, 1], [], []>} : vector<8x32xbf16>, vector<32x128xbf16>, vector<8x128xf32> -> vector<8x128xf32>
    %208 = arith.addf %205, %207 : vector<8x128xf32>
    %209 = vector.extract_strided_slice %208 {offsets = [0, 0], sizes = [8, 96], strides = [1, 1]} : vector<8x128xf32> to vector<8x96xf32>
    %210 = arith.negf %209 : vector<8x96xf32>
    %211 = math.exp %210 : vector<8x96xf32>
    %cst_62 = arith.constant 1.000000e+00 : f32
    %212 = vector.broadcast %cst_62 : f32 to vector<8x96xf32>
    %213 = arith.addf %212, %211 : vector<8x96xf32>
    %214 = arith.divf %212, %213 : vector<8x96xf32>
    %215 = vector.extract_strided_slice %208 {offsets = [0, 96], sizes = [8, 32], strides = [1, 1]} : vector<8x128xf32> to vector<8x32xf32>
    %216 = math.tanh %215 : vector<8x32xf32>
    %217 = vector.extract_strided_slice %214 {offsets = [0, 0], sizes = [8, 32], strides = [1, 1]} : vector<8x96xf32> to vector<8x32xf32>
    %218 = vector.extract_strided_slice %214 {offsets = [0, 32], sizes = [8, 32], strides = [1, 1]} : vector<8x96xf32> to vector<8x32xf32>
    %219 = vector.extract_strided_slice %214 {offsets = [0, 64], sizes = [8, 32], strides = [1, 1]} : vector<8x96xf32> to vector<8x32xf32>
    %220 = arith.mulf %218, %195 : vector<8x32xf32>
    %221 = arith.mulf %217, %216 : vector<8x32xf32>
    %222 = arith.addf %220, %221 : vector<8x32xf32>
    %223 = math.tanh %222 : vector<8x32xf32>
    %224 = arith.mulf %219, %223 : vector<8x32xf32>
    %225 = arith.truncf %224 : vector<8x32xf32> to vector<8x32xbf16>
    %226 = arith.index_cast %c7_i32 : i32 to index
    %c0_63 = arith.constant 0 : index
    %c0_64 = arith.constant 0 : index
    %227 = vector.load %arg15[%226, %c0_63, %c0_64] : memref<8x8x32xbf16, #tpu.memory_space<vmem>>, vector<1x8x32xbf16>
    %228 = vector.shape_cast %227 : vector<1x8x32xbf16> to vector<8x32xbf16>
    %229 = vector.shape_cast %225 : vector<8x32xbf16> to vector<1x8x32xbf16>
    tpu.vector_store %arg15[%226, %c0_63, %c0_64], %229 {strides = array<i32>} : memref<8x8x32xbf16, #tpu.memory_space<vmem>>, vector<1x8x32xbf16>,
    %c8_i32 = arith.constant 8 : i32
    %c0_65 = arith.constant 0 : index
    %c0_66 = arith.constant 0 : index
    %c0_67 = arith.constant 0 : index
    %230 = vector.load %arg12[%c0_65, %c0_66, %c0_67] : memref<2x8x32xf32, #tpu.memory_space<vmem>>, vector<1x8x32xf32>
    %231 = vector.shape_cast %230 : vector<1x8x32xf32> to vector<8x32xf32>
    %232 = vector.shape_cast %224 : vector<8x32xf32> to vector<1x8x32xf32>
    tpu.vector_store %arg12[%c0_65, %c0_66, %c0_67], %232 {strides = array<i32>} : memref<2x8x32xf32, #tpu.memory_space<vmem>>, vector<1x8x32xf32>,
    %c0_68 = arith.constant 0 : index
    %c0_69 = arith.constant 0 : index
    %c0_70 = arith.constant 0 : index
    %233 = vector.load %arg13[%c0_68, %c0_69, %c0_70] : memref<2x8x32xf32, #tpu.memory_space<vmem>>, vector<1x8x32xf32>
    %234 = vector.shape_cast %233 : vector<1x8x32xf32> to vector<8x32xf32>
    %235 = vector.shape_cast %222 : vector<8x32xf32> to vector<1x8x32xf32>
    tpu.vector_store %arg13[%c0_68, %c0_69, %c0_70], %235 {strides = array<i32>} : memref<2x8x32xf32, #tpu.memory_space<vmem>>, vector<1x8x32xf32>,
    %c0_71 = arith.constant 0 : index
    %c0_72 = arith.constant 0 : index
    %c0_73 = arith.constant 0 : index
    %236 = vector.load %arg15[%c0_71, %c0_72, %c0_73] : memref<8x8x32xbf16, #tpu.memory_space<vmem>>, vector<8x8x32xbf16>
    %237 = vector.shape_cast %236 : vector<8x8x32xbf16> to vector<64x32xbf16>
    %c0_74 = arith.constant 0 : index
    %c0_75 = arith.constant 0 : index
    %238 = vector.load %arg4[%c0_74, %c0_75] : memref<32x128xbf16, #tpu.memory_space<vmem>>, vector<32x128xbf16>
    %cst_76 = arith.constant dense<0.000000e+00> : vector<64x128xf32>
    %239 = tpu.matmul %237, %238, %cst_76 {dimension_numbers = #tpu.dot_dimension_numbers<[1], [0], [0], [1], [0, 0, 1, 1], [], []>} : vector<64x32xbf16>, vector<32x128xbf16>, vector<64x128xf32> -> vector<64x128xf32>
    %c0_77 = arith.constant 0 : index
    %c0_78 = arith.constant 0 : index
    %240 = vector.load %arg6[%c0_77, %c0_78] : memref<1x128xf32, #tpu.memory_space<vmem>>, vector<1x128xf32>
    %241 = vector.broadcast %240 : vector<1x128xf32> to vector<64x128xf32>
    %242 = arith.addf %239, %241 : vector<64x128xf32>
    %243 = vector.shape_cast %242 : vector<64x128xf32> to vector<8x8x128xf32>
    %c0_79 = arith.constant 0 : index
    %c0_80 = arith.constant 0 : index
    %c0_81 = arith.constant 0 : index
    %244 = vector.load %arg14[%c0_79, %c0_80, %c0_81] : memref<8x8x128xf32, #tpu.memory_space<vmem>>, vector<8x8x128xf32>
    tpu.vector_store %arg14[%c0_79, %c0_80, %c0_81], %243 {strides = array<i32>} : memref<8x8x128xf32, #tpu.memory_space<vmem>>, vector<8x8x128xf32>,
    %c0_82 = arith.constant 0 : index
    %c0_83 = arith.constant 0 : index
    %245 = vector.load %arg5[%c0_82, %c0_83] : memref<32x128xbf16, #tpu.memory_space<vmem>>, vector<32x128xbf16>
    %c1 = arith.constant 1 : index
    %c0_84 = arith.constant 0 : index
    %c0_85 = arith.constant 0 : index
    %246 = vector.load %arg7[%c1, %c0_84, %c0_85] : memref<2x8x32xf32, #tpu.memory_space<vmem>>, vector<1x8x32xf32>
    %247 = vector.shape_cast %246 : vector<1x8x32xf32> to vector<8x32xf32>
    %c1_86 = arith.constant 1 : index
    %c0_87 = arith.constant 0 : index
    %c0_88 = arith.constant 0 : index
    %248 = vector.load %arg8[%c1_86, %c0_87, %c0_88] : memref<2x8x32xf32, #tpu.memory_space<vmem>>, vector<1x8x32xf32>
    %249 = vector.shape_cast %248 : vector<1x8x32xf32> to vector<8x32xf32>
    %c0_i32_89 = arith.constant 0 : i32
    %250 = arith.index_cast %c0_i32_89 : i32 to index
    %c0_90 = arith.constant 0 : index
    %c0_91 = arith.constant 0 : index
    %251 = vector.load %arg14[%250, %c0_90, %c0_91] : memref<8x8x128xf32, #tpu.memory_space<vmem>>, vector<1x8x128xf32>
    %252 = vector.shape_cast %251 : vector<1x8x128xf32> to vector<8x128xf32>
    %253 = arith.truncf %247 : vector<8x32xf32> to vector<8x32xbf16>
    %cst_92 = arith.constant dense<0.000000e+00> : vector<8x128xf32>
    %254 = tpu.matmul %253, %245, %cst_92 {dimension_numbers = #tpu.dot_dimension_numbers<[1], [0], [0], [1], [0, 0, 1, 1], [], []>} : vector<8x32xbf16>, vector<32x128xbf16>, vector<8x128xf32> -> vector<8x128xf32>
    %255 = arith.addf %252, %254 : vector<8x128xf32>
    %256 = vector.extract_strided_slice %255 {offsets = [0, 0], sizes = [8, 96], strides = [1, 1]} : vector<8x128xf32> to vector<8x96xf32>
    %257 = arith.negf %256 : vector<8x96xf32>
    %258 = math.exp %257 : vector<8x96xf32>
    %cst_93 = arith.constant 1.000000e+00 : f32
    %259 = vector.broadcast %cst_93 : f32 to vector<8x96xf32>
    %260 = arith.addf %259, %258 : vector<8x96xf32>
    %261 = arith.divf %259, %260 : vector<8x96xf32>
    %262 = vector.extract_strided_slice %255 {offsets = [0, 96], sizes = [8, 32], strides = [1, 1]} : vector<8x128xf32> to vector<8x32xf32>
    %263 = math.tanh %262 : vector<8x32xf32>
    %264 = vector.extract_strided_slice %261 {offsets = [0, 0], sizes = [8, 32], strides = [1, 1]} : vector<8x96xf32> to vector<8x32xf32>
    %265 = vector.extract_strided_slice %261 {offsets = [0, 32], sizes = [8, 32], strides = [1, 1]} : vector<8x96xf32> to vector<8x32xf32>
    %266 = vector.extract_strided_slice %261 {offsets = [0, 64], sizes = [8, 32], strides = [1, 1]} : vector<8x96xf32> to vector<8x32xf32>
    %267 = arith.mulf %265, %249 : vector<8x32xf32>
    %268 = arith.mulf %264, %263 : vector<8x32xf32>
    %269 = arith.addf %267, %268 : vector<8x32xf32>
    %270 = math.tanh %269 : vector<8x32xf32>
    %271 = arith.mulf %266, %270 : vector<8x32xf32>
    %c1_i32_94 = arith.constant 1 : i32
    %272 = arith.index_cast %c1_i32_94 : i32 to index
    %c0_95 = arith.constant 0 : index
    %c0_96 = arith.constant 0 : index
    %273 = vector.load %arg14[%272, %c0_95, %c0_96] : memref<8x8x128xf32, #tpu.memory_space<vmem>>, vector<1x8x128xf32>
    %274 = vector.shape_cast %273 : vector<1x8x128xf32> to vector<8x128xf32>
    %275 = arith.truncf %271 : vector<8x32xf32> to vector<8x32xbf16>
    %cst_97 = arith.constant dense<0.000000e+00> : vector<8x128xf32>
    %276 = tpu.matmul %275, %245, %cst_97 {dimension_numbers = #tpu.dot_dimension_numbers<[1], [0], [0], [1], [0, 0, 1, 1], [], []>} : vector<8x32xbf16>, vector<32x128xbf16>, vector<8x128xf32> -> vector<8x128xf32>
    %277 = arith.addf %274, %276 : vector<8x128xf32>
    %278 = vector.extract_strided_slice %277 {offsets = [0, 0], sizes = [8, 96], strides = [1, 1]} : vector<8x128xf32> to vector<8x96xf32>
    %279 = arith.negf %278 : vector<8x96xf32>
    %280 = math.exp %279 : vector<8x96xf32>
    %cst_98 = arith.constant 1.000000e+00 : f32
    %281 = vector.broadcast %cst_98 : f32 to vector<8x96xf32>
    %282 = arith.addf %281, %280 : vector<8x96xf32>
    %283 = arith.divf %281, %282 : vector<8x96xf32>
    %284 = vector.extract_strided_slice %277 {offsets = [0, 96], sizes = [8, 32], strides = [1, 1]} : vector<8x128xf32> to vector<8x32xf32>
    %285 = math.tanh %284 : vector<8x32xf32>
    %286 = vector.extract_strided_slice %283 {offsets = [0, 0], sizes = [8, 32], strides = [1, 1]} : vector<8x96xf32> to vector<8x32xf32>
    %287 = vector.extract_strided_slice %283 {offsets = [0, 32], sizes = [8, 32], strides = [1, 1]} : vector<8x96xf32> to vector<8x32xf32>
    %288 = vector.extract_strided_slice %283 {offsets = [0, 64], sizes = [8, 32], strides = [1, 1]} : vector<8x96xf32> to vector<8x32xf32>
    %289 = arith.mulf %287, %269 : vector<8x32xf32>
    %290 = arith.mulf %286, %285 : vector<8x32xf32>
    %291 = arith.addf %289, %290 : vector<8x32xf32>
    %292 = math.tanh %291 : vector<8x32xf32>
    %293 = arith.mulf %288, %292 : vector<8x32xf32>
    %c2_i32_99 = arith.constant 2 : i32
    %294 = arith.index_cast %c2_i32_99 : i32 to index
    %c0_100 = arith.constant 0 : index
    %c0_101 = arith.constant 0 : index
    %295 = vector.load %arg14[%294, %c0_100, %c0_101] : memref<8x8x128xf32, #tpu.memory_space<vmem>>, vector<1x8x128xf32>
    %296 = vector.shape_cast %295 : vector<1x8x128xf32> to vector<8x128xf32>
    %297 = arith.truncf %293 : vector<8x32xf32> to vector<8x32xbf16>
    %cst_102 = arith.constant dense<0.000000e+00> : vector<8x128xf32>
    %298 = tpu.matmul %297, %245, %cst_102 {dimension_numbers = #tpu.dot_dimension_numbers<[1], [0], [0], [1], [0, 0, 1, 1], [], []>} : vector<8x32xbf16>, vector<32x128xbf16>, vector<8x128xf32> -> vector<8x128xf32>
    %299 = arith.addf %296, %298 : vector<8x128xf32>
    %300 = vector.extract_strided_slice %299 {offsets = [0, 0], sizes = [8, 96], strides = [1, 1]} : vector<8x128xf32> to vector<8x96xf32>
    %301 = arith.negf %300 : vector<8x96xf32>
    %302 = math.exp %301 : vector<8x96xf32>
    %cst_103 = arith.constant 1.000000e+00 : f32
    %303 = vector.broadcast %cst_103 : f32 to vector<8x96xf32>
    %304 = arith.addf %303, %302 : vector<8x96xf32>
    %305 = arith.divf %303, %304 : vector<8x96xf32>
    %306 = vector.extract_strided_slice %299 {offsets = [0, 96], sizes = [8, 32], strides = [1, 1]} : vector<8x128xf32> to vector<8x32xf32>
    %307 = math.tanh %306 : vector<8x32xf32>
    %308 = vector.extract_strided_slice %305 {offsets = [0, 0], sizes = [8, 32], strides = [1, 1]} : vector<8x96xf32> to vector<8x32xf32>
    %309 = vector.extract_strided_slice %305 {offsets = [0, 32], sizes = [8, 32], strides = [1, 1]} : vector<8x96xf32> to vector<8x32xf32>
    %310 = vector.extract_strided_slice %305 {offsets = [0, 64], sizes = [8, 32], strides = [1, 1]} : vector<8x96xf32> to vector<8x32xf32>
    %311 = arith.mulf %309, %291 : vector<8x32xf32>
    %312 = arith.mulf %308, %307 : vector<8x32xf32>
    %313 = arith.addf %311, %312 : vector<8x32xf32>
    %314 = math.tanh %313 : vector<8x32xf32>
    %315 = arith.mulf %310, %314 : vector<8x32xf32>
    %c3_i32_104 = arith.constant 3 : i32
    %316 = arith.index_cast %c3_i32_104 : i32 to index
    %c0_105 = arith.constant 0 : index
    %c0_106 = arith.constant 0 : index
    %317 = vector.load %arg14[%316, %c0_105, %c0_106] : memref<8x8x128xf32, #tpu.memory_space<vmem>>, vector<1x8x128xf32>
    %318 = vector.shape_cast %317 : vector<1x8x128xf32> to vector<8x128xf32>
    %319 = arith.truncf %315 : vector<8x32xf32> to vector<8x32xbf16>
    %cst_107 = arith.constant dense<0.000000e+00> : vector<8x128xf32>
    %320 = tpu.matmul %319, %245, %cst_107 {dimension_numbers = #tpu.dot_dimension_numbers<[1], [0], [0], [1], [0, 0, 1, 1], [], []>} : vector<8x32xbf16>, vector<32x128xbf16>, vector<8x128xf32> -> vector<8x128xf32>
    %321 = arith.addf %318, %320 : vector<8x128xf32>
    %322 = vector.extract_strided_slice %321 {offsets = [0, 0], sizes = [8, 96], strides = [1, 1]} : vector<8x128xf32> to vector<8x96xf32>
    %323 = arith.negf %322 : vector<8x96xf32>
    %324 = math.exp %323 : vector<8x96xf32>
    %cst_108 = arith.constant 1.000000e+00 : f32
    %325 = vector.broadcast %cst_108 : f32 to vector<8x96xf32>
    %326 = arith.addf %325, %324 : vector<8x96xf32>
    %327 = arith.divf %325, %326 : vector<8x96xf32>
    %328 = vector.extract_strided_slice %321 {offsets = [0, 96], sizes = [8, 32], strides = [1, 1]} : vector<8x128xf32> to vector<8x32xf32>
    %329 = math.tanh %328 : vector<8x32xf32>
    %330 = vector.extract_strided_slice %327 {offsets = [0, 0], sizes = [8, 32], strides = [1, 1]} : vector<8x96xf32> to vector<8x32xf32>
    %331 = vector.extract_strided_slice %327 {offsets = [0, 32], sizes = [8, 32], strides = [1, 1]} : vector<8x96xf32> to vector<8x32xf32>
    %332 = vector.extract_strided_slice %327 {offsets = [0, 64], sizes = [8, 32], strides = [1, 1]} : vector<8x96xf32> to vector<8x32xf32>
    %333 = arith.mulf %331, %313 : vector<8x32xf32>
    %334 = arith.mulf %330, %329 : vector<8x32xf32>
    %335 = arith.addf %333, %334 : vector<8x32xf32>
    %336 = math.tanh %335 : vector<8x32xf32>
    %337 = arith.mulf %332, %336 : vector<8x32xf32>
    %c4_i32_109 = arith.constant 4 : i32
    %338 = arith.index_cast %c4_i32_109 : i32 to index
    %c0_110 = arith.constant 0 : index
    %c0_111 = arith.constant 0 : index
    %339 = vector.load %arg14[%338, %c0_110, %c0_111] : memref<8x8x128xf32, #tpu.memory_space<vmem>>, vector<1x8x128xf32>
    %340 = vector.shape_cast %339 : vector<1x8x128xf32> to vector<8x128xf32>
    %341 = arith.truncf %337 : vector<8x32xf32> to vector<8x32xbf16>
    %cst_112 = arith.constant dense<0.000000e+00> : vector<8x128xf32>
    %342 = tpu.matmul %341, %245, %cst_112 {dimension_numbers = #tpu.dot_dimension_numbers<[1], [0], [0], [1], [0, 0, 1, 1], [], []>} : vector<8x32xbf16>, vector<32x128xbf16>, vector<8x128xf32> -> vector<8x128xf32>
    %343 = arith.addf %340, %342 : vector<8x128xf32>
    %344 = vector.extract_strided_slice %343 {offsets = [0, 0], sizes = [8, 96], strides = [1, 1]} : vector<8x128xf32> to vector<8x96xf32>
    %345 = arith.negf %344 : vector<8x96xf32>
    %346 = math.exp %345 : vector<8x96xf32>
    %cst_113 = arith.constant 1.000000e+00 : f32
    %347 = vector.broadcast %cst_113 : f32 to vector<8x96xf32>
    %348 = arith.addf %347, %346 : vector<8x96xf32>
    %349 = arith.divf %347, %348 : vector<8x96xf32>
    %350 = vector.extract_strided_slice %343 {offsets = [0, 96], sizes = [8, 32], strides = [1, 1]} : vector<8x128xf32> to vector<8x32xf32>
    %351 = math.tanh %350 : vector<8x32xf32>
    %352 = vector.extract_strided_slice %349 {offsets = [0, 0], sizes = [8, 32], strides = [1, 1]} : vector<8x96xf32> to vector<8x32xf32>
    %353 = vector.extract_strided_slice %349 {offsets = [0, 32], sizes = [8, 32], strides = [1, 1]} : vector<8x96xf32> to vector<8x32xf32>
    %354 = vector.extract_strided_slice %349 {offsets = [0, 64], sizes = [8, 32], strides = [1, 1]} : vector<8x96xf32> to vector<8x32xf32>
    %355 = arith.mulf %353, %335 : vector<8x32xf32>
    %356 = arith.mulf %352, %351 : vector<8x32xf32>
    %357 = arith.addf %355, %356 : vector<8x32xf32>
    %358 = math.tanh %357 : vector<8x32xf32>
    %359 = arith.mulf %354, %358 : vector<8x32xf32>
    %c5_i32_114 = arith.constant 5 : i32
    %360 = arith.index_cast %c5_i32_114 : i32 to index
    %c0_115 = arith.constant 0 : index
    %c0_116 = arith.constant 0 : index
    %361 = vector.load %arg14[%360, %c0_115, %c0_116] : memref<8x8x128xf32, #tpu.memory_space<vmem>>, vector<1x8x128xf32>
    %362 = vector.shape_cast %361 : vector<1x8x128xf32> to vector<8x128xf32>
    %363 = arith.truncf %359 : vector<8x32xf32> to vector<8x32xbf16>
    %cst_117 = arith.constant dense<0.000000e+00> : vector<8x128xf32>
    %364 = tpu.matmul %363, %245, %cst_117 {dimension_numbers = #tpu.dot_dimension_numbers<[1], [0], [0], [1], [0, 0, 1, 1], [], []>} : vector<8x32xbf16>, vector<32x128xbf16>, vector<8x128xf32> -> vector<8x128xf32>
    %365 = arith.addf %362, %364 : vector<8x128xf32>
    %366 = vector.extract_strided_slice %365 {offsets = [0, 0], sizes = [8, 96], strides = [1, 1]} : vector<8x128xf32> to vector<8x96xf32>
    %367 = arith.negf %366 : vector<8x96xf32>
    %368 = math.exp %367 : vector<8x96xf32>
    %cst_118 = arith.constant 1.000000e+00 : f32
    %369 = vector.broadcast %cst_118 : f32 to vector<8x96xf32>
    %370 = arith.addf %369, %368 : vector<8x96xf32>
    %371 = arith.divf %369, %370 : vector<8x96xf32>
    %372 = vector.extract_strided_slice %365 {offsets = [0, 96], sizes = [8, 32], strides = [1, 1]} : vector<8x128xf32> to vector<8x32xf32>
    %373 = math.tanh %372 : vector<8x32xf32>
    %374 = vector.extract_strided_slice %371 {offsets = [0, 0], sizes = [8, 32], strides = [1, 1]} : vector<8x96xf32> to vector<8x32xf32>
    %375 = vector.extract_strided_slice %371 {offsets = [0, 32], sizes = [8, 32], strides = [1, 1]} : vector<8x96xf32> to vector<8x32xf32>
    %376 = vector.extract_strided_slice %371 {offsets = [0, 64], sizes = [8, 32], strides = [1, 1]} : vector<8x96xf32> to vector<8x32xf32>
    %377 = arith.mulf %375, %357 : vector<8x32xf32>
    %378 = arith.mulf %374, %373 : vector<8x32xf32>
    %379 = arith.addf %377, %378 : vector<8x32xf32>
    %380 = math.tanh %379 : vector<8x32xf32>
    %381 = arith.mulf %376, %380 : vector<8x32xf32>
    %c6_i32_119 = arith.constant 6 : i32
    %382 = arith.index_cast %c6_i32_119 : i32 to index
    %c0_120 = arith.constant 0 : index
    %c0_121 = arith.constant 0 : index
    %383 = vector.load %arg14[%382, %c0_120, %c0_121] : memref<8x8x128xf32, #tpu.memory_space<vmem>>, vector<1x8x128xf32>
    %384 = vector.shape_cast %383 : vector<1x8x128xf32> to vector<8x128xf32>
    %385 = arith.truncf %381 : vector<8x32xf32> to vector<8x32xbf16>
    %cst_122 = arith.constant dense<0.000000e+00> : vector<8x128xf32>
    %386 = tpu.matmul %385, %245, %cst_122 {dimension_numbers = #tpu.dot_dimension_numbers<[1], [0], [0], [1], [0, 0, 1, 1], [], []>} : vector<8x32xbf16>, vector<32x128xbf16>, vector<8x128xf32> -> vector<8x128xf32>
    %387 = arith.addf %384, %386 : vector<8x128xf32>
    %388 = vector.extract_strided_slice %387 {offsets = [0, 0], sizes = [8, 96], strides = [1, 1]} : vector<8x128xf32> to vector<8x96xf32>
    %389 = arith.negf %388 : vector<8x96xf32>
    %390 = math.exp %389 : vector<8x96xf32>
    %cst_123 = arith.constant 1.000000e+00 : f32
    %391 = vector.broadcast %cst_123 : f32 to vector<8x96xf32>
    %392 = arith.addf %391, %390 : vector<8x96xf32>
    %393 = arith.divf %391, %392 : vector<8x96xf32>
    %394 = vector.extract_strided_slice %387 {offsets = [0, 96], sizes = [8, 32], strides = [1, 1]} : vector<8x128xf32> to vector<8x32xf32>
    %395 = math.tanh %394 : vector<8x32xf32>
    %396 = vector.extract_strided_slice %393 {offsets = [0, 0], sizes = [8, 32], strides = [1, 1]} : vector<8x96xf32> to vector<8x32xf32>
    %397 = vector.extract_strided_slice %393 {offsets = [0, 32], sizes = [8, 32], strides = [1, 1]} : vector<8x96xf32> to vector<8x32xf32>
    %398 = vector.extract_strided_slice %393 {offsets = [0, 64], sizes = [8, 32], strides = [1, 1]} : vector<8x96xf32> to vector<8x32xf32>
    %399 = arith.mulf %397, %379 : vector<8x32xf32>
    %400 = arith.mulf %396, %395 : vector<8x32xf32>
    %401 = arith.addf %399, %400 : vector<8x32xf32>
    %402 = math.tanh %401 : vector<8x32xf32>
    %403 = arith.mulf %398, %402 : vector<8x32xf32>
    %c7_i32_124 = arith.constant 7 : i32
    %404 = arith.index_cast %c7_i32_124 : i32 to index
    %c0_125 = arith.constant 0 : index
    %c0_126 = arith.constant 0 : index
    %405 = vector.load %arg14[%404, %c0_125, %c0_126] : memref<8x8x128xf32, #tpu.memory_space<vmem>>, vector<1x8x128xf32>
    %406 = vector.shape_cast %405 : vector<1x8x128xf32> to vector<8x128xf32>
    %407 = arith.truncf %403 : vector<8x32xf32> to vector<8x32xbf16>
    %cst_127 = arith.constant dense<0.000000e+00> : vector<8x128xf32>
    %408 = tpu.matmul %407, %245, %cst_127 {dimension_numbers = #tpu.dot_dimension_numbers<[1], [0], [0], [1], [0, 0, 1, 1], [], []>} : vector<8x32xbf16>, vector<32x128xbf16>, vector<8x128xf32> -> vector<8x128xf32>
    %409 = arith.addf %406, %408 : vector<8x128xf32>
    %410 = vector.extract_strided_slice %409 {offsets = [0, 0], sizes = [8, 96], strides = [1, 1]} : vector<8x128xf32> to vector<8x96xf32>
    %411 = arith.negf %410 : vector<8x96xf32>
    %412 = math.exp %411 : vector<8x96xf32>
    %cst_128 = arith.constant 1.000000e+00 : f32
    %413 = vector.broadcast %cst_128 : f32 to vector<8x96xf32>
    %414 = arith.addf %413, %412 : vector<8x96xf32>
    %415 = arith.divf %413, %414 : vector<8x96xf32>
    %416 = vector.extract_strided_slice %409 {offsets = [0, 96], sizes = [8, 32], strides = [1, 1]} : vector<8x128xf32> to vector<8x32xf32>
    %417 = math.tanh %416 : vector<8x32xf32>
    %418 = vector.extract_strided_slice %415 {offsets = [0, 0], sizes = [8, 32], strides = [1, 1]} : vector<8x96xf32> to vector<8x32xf32>
    %419 = vector.extract_strided_slice %415 {offsets = [0, 32], sizes = [8, 32], strides = [1, 1]} : vector<8x96xf32> to vector<8x32xf32>
    %420 = vector.extract_strided_slice %415 {offsets = [0, 64], sizes = [8, 32], strides = [1, 1]} : vector<8x96xf32> to vector<8x32xf32>
    %421 = arith.mulf %419, %401 : vector<8x32xf32>
    %422 = arith.mulf %418, %417 : vector<8x32xf32>
    %423 = arith.addf %421, %422 : vector<8x32xf32>
    %424 = math.tanh %423 : vector<8x32xf32>
    %425 = arith.mulf %420, %424 : vector<8x32xf32>
    %c8_i32_129 = arith.constant 8 : i32
    %c1_130 = arith.constant 1 : index
    %c0_131 = arith.constant 0 : index
    %c0_132 = arith.constant 0 : index
    %426 = vector.load %arg12[%c1_130, %c0_131, %c0_132] : memref<2x8x32xf32, #tpu.memory_space<vmem>>, vector<1x8x32xf32>
    %427 = vector.shape_cast %426 : vector<1x8x32xf32> to vector<8x32xf32>
    %428 = vector.shape_cast %425 : vector<8x32xf32> to vector<1x8x32xf32>
    tpu.vector_store %arg12[%c1_130, %c0_131, %c0_132], %428 {strides = array<i32>} : memref<2x8x32xf32, #tpu.memory_space<vmem>>, vector<1x8x32xf32>,
    %c1_133 = arith.constant 1 : index
    %c0_134 = arith.constant 0 : index
    %c0_135 = arith.constant 0 : index
    %429 = vector.load %arg13[%c1_133, %c0_134, %c0_135] : memref<2x8x32xf32, #tpu.memory_space<vmem>>, vector<1x8x32xf32>
    %430 = vector.shape_cast %429 : vector<1x8x32xf32> to vector<8x32xf32>
    %431 = vector.shape_cast %423 : vector<8x32xf32> to vector<1x8x32xf32>
    tpu.vector_store %arg13[%c1_133, %c0_134, %c0_135], %431 {strides = array<i32>} : memref<2x8x32xf32, #tpu.memory_space<vmem>>, vector<1x8x32xf32>,
    %c0_136 = arith.constant 0 : index
    %c0_137 = arith.constant 0 : index
    %432 = vector.load %arg9[%c0_136, %c0_137] : memref<32x1xf32, #tpu.memory_space<vmem>>, vector<32x1xf32>
    %cst_138 = arith.constant dense<0.000000e+00> : vector<8x1xf32>
    %433 = tpu.matmul %425, %432, %cst_138 {dimension_numbers = #tpu.dot_dimension_numbers<[1], [0], [0], [1], [0, 0, 1, 1], [], []>} : vector<8x32xf32>, vector<32x1xf32>, vector<8x1xf32> -> vector<8x1xf32>
    %c0_139 = arith.constant 0 : index
    %c0_140 = arith.constant 0 : index
    %434 = vector.load %arg10[%c0_139, %c0_140] : memref<1x1xf32, #tpu.memory_space<vmem>>, vector<1x1xf32>
    %435 = vector.broadcast %434 : vector<1x1xf32> to vector<8x1xf32>
    %436 = arith.addf %433, %435 : vector<8x1xf32>
    %437 = arith.negf %436 : vector<8x1xf32>
    %438 = math.exp %437 : vector<8x1xf32>
    %cst_141 = arith.constant 1.000000e+00 : f32
    %439 = vector.broadcast %cst_141 : f32 to vector<8x1xf32>
    %440 = arith.addf %439, %438 : vector<8x1xf32>
    %441 = arith.divf %439, %440 : vector<8x1xf32>
    %c0_142 = arith.constant 0 : index
    %c0_143 = arith.constant 0 : index
    %442 = vector.load %arg11[%c0_142, %c0_143] : memref<8x1xf32, #tpu.memory_space<vmem>>, vector<8x1xf32>
    tpu.vector_store %arg11[%c0_142, %c0_143], %441 {strides = array<i32>} : memref<8x1xf32, #tpu.memory_space<vmem>>, vector<8x1xf32>,
    return
  }
}

</mosaic_0001>

<bundles_post_ra>
// kernel: lstm_forward.1
= control target key start
LH: loop header
LB: loop body
LE: loop exit
PB: predicated region body
PF: predicated region fallthrough
CT: control target
= control target key end

     0   :  { %v2184_v1 = vmov 0.0   ;;  %vm2185_vm0 = vmmov 0   ;;  %vm95_vm1 = vcmask 261120   ;;  %s2186_s22 = smov 32   ;;  %s2187_s24 = smov 64   ;;  %vm280_vm2 = vcmask 257024   ;;  %s2661_s1 = inlined_call_operand.vmem [shape: bf16[32,128], index: 1, kind: input, shape index: {}]   ;;  %s2662_s2 = inlined_call_operand.vmem [shape: bf16[32,128], index: 2, kind: input, shape index: {}]   ;;  %s2663_s0 = inlined_call_operand.vmem [shape: bf16[8,8,32], index: 0, kind: input, shape index: {}]   ;;  %s2664_s7 = inlined_call_operand.vmem [shape: f32[2,8,32], index: 7, kind: input, shape index: {}]   ;;  %s2665_s3 = inlined_call_operand.vmem [shape: f32[1,128], index: 3, kind: input, shape index: {}]   ;;  %s2666_s8 = inlined_call_operand.vmem [shape: f32[2,8,32], index: 8, kind: input, shape index: {}]   ;;  %s2667_s4 = inlined_call_operand.vmem [shape: bf16[32,128], index: 4, kind: input, shape index: {}]   ;;  %s2668_s5 = inlined_call_operand.vmem [shape: bf16[32,128], index: 5, kind: input, shape index: {}]   ;;  %s2669_s6 = inlined_call_operand.vmem [shape: f32[1,128], index: 6, kind: input, shape index: {}]   ;;  %s2670_s9 = inlined_call_operand.vmem [shape: f32[32,1], index: 9, kind: input, shape index: {}]   ;;  %s2671_s10 = inlined_call_operand.<no memory space> [shape: f32[1,1], index: 10, kind: input, shape index: {}]   ;;  %s2672_s12 = inlined_call_operand.vmem [shape: f32[2,8,32], index: 12, kind: output, shape index: {1}]   ;;  %s2673_s13 = inlined_call_operand.vmem [shape: f32[2,8,32], index: 13, kind: output, shape index: {2}]   ;;  %s2674_s11 = inlined_call_operand.vmem [shape: f32[8,1], index: 11, kind: output, shape index: {0}]  }
   0x1   :  { %v2036_v0 = vld [vmem:[%s2661_s1] sm:$0xff]   ;;  %1873 = vmatprep.subr.bf16.mxu1 %v2184_v1  ;;  %1877 = vmatprep.mubr.msk.bf16.mxu1 %vm2185_vm0, %v2184_v1  ;;  %v2038_v3 = vld [vmem:[%s2661_s1 + $0x8] sm:$0xff]   ;;  %v2042_v53 = vld [vmem:[%s2663_s0 + $0x10] sm:$0xff]   ;;  %s2189_s27 = smov 96   ;;  %vm1701_vm3 = vcmask 7168  }
   0x2   :  { %v2269_v2 = vld [vmem:[%s2662_s2] sm:$0xff]   ;;  %1861 = vmatprep.subr.bf16.mxu0 %v2036_v0  ;;  %v2278_v4 = vld [vmem:[%s2662_s2 + $0x8] sm:$0xff]   ;;  %v2043_v54 = vld [vmem:[%s2663_s0 + $0x18] sm:$0xff]  }
   0x3   :  { %1862 = vmatpush3.bf16.msra.mxu0 %v2036_v0  ;;  %1874 = vmatpush3.bf16.msra.mxu1 %v2269_v2  ;;  %v2040_v5 = vld [vmem:[%s2663_s0] sm:$0xff]   ;;  %v2041_v6 = vld [vmem:[%s2663_s0 + $0x8] sm:$0xff]  }
   0x4   :  { %1863 = vmatprep.subr.bf16.mxu0 %v2038_v3  ;;  %1875 = vmatprep.subr.bf16.mxu1 %v2184_v1  ;;  %v185_v7 = vld [vmem:[%s2664_s7] sm:$0xff] }
   0x5   :  { %1865 = vmatprep.mubr.msk.bf16.mxu0 %vm95_vm1, %v2040_v5  ;;  %v188_v8 = vpack.c.bf16 %v185_v7, %v185_v7  ;;  %v2309_v9 = vld [vmem:[%s2665_s3] ss:$0 sm:$0xff] }
   0x6   :  { %v186_v21 = vld [vmem:[%s2666_s8] sm:$0xff] }
   0x7   :  { %1864 = vmatpush3.bf16.msra.mxu0 %v2038_v3  ;;  %1876 = vmatpush3.bf16.msra.mxu1 %v2278_v4 }
   0x8   :  { %1881 = vmatprep.subr.bf16.mxu1 %v2184_v1  ;;  %1889 = vmatprep.subr.bf16.mxu0 %v2184_v1 }
   0xa   :  { %1866 = vmatmul.mubr.msk.bf16.vlgmr.msra.gmra.mrb[0].mxu0 %vm95_vm1, %v2041_v6  ;;  %1878 = vmatmul.mubr.msk.bf16.vlgmr.msra.gmra.mrb[0].mxu1 %vm95_vm1, %v188_v8 }
   0xb   :  { %1882 = vmatpush3.bf16.msra.mxu1 %v2269_v2  ;;  %1885 = vmatprep.mubr.msk.bf16.mxu1 %vm2185_vm0, %v2184_v1 }
   0xc   :  { %1883 = vmatprep.subr.bf16.mxu1 %v2184_v1  ;;  %1890 = vmatpush3.bf16.msra.mxu0 %v2269_v2 }
   0xd   :  { %1891 = vmatprep.subr.bf16.mxu0 %v2184_v1  ;;  %1869 = vmatprep.mubr.msk.bf16.mxu0 %vm95_vm1, %v2042_v53 }
   0xf   :  { %1884 = vmatpush3.bf16.msra.mxu1 %v2278_v4 }
  0x10   :  { %1892 = vmatpush3.bf16.msra.mxu0 %v2278_v4  ;;  %1897 = vmatprep.subr.bf16.mxu1 %v2184_v1 }
  0x11   :  { %1905 = vmatprep.subr.bf16.mxu0 %v2184_v1 }
  0x12   :  { %1870 = vmatmul.mubr.msk.bf16.gmra.mrb[4].mxu0 %vm95_vm1, %v2043_v54 }
  0x13   :  { %1893 = vmatprep.mubr.msk.bf16.mxu0 %vm2185_vm0, %v2184_v1 }
  0xdd   :  { %v2311_v10 = vpop.f32.mrb[0].mxu0  ;;  %v238_v11 = vpop.f32.mrb[0].mxu1 }
  0xde   :  { %v142_v12 = vpop.f32.mrb[1].mxu0  ;;  %v1879_v13 = vpop.f32.mrb[1].mxu1  ;;  %v151_v0 = vadd.f32 %v2311_v10, %v2309_v9 }
  0xdf   :  { %v143_v14 = vadd.f32 %v2309_v9, %v142_v12  ;;  %v2314_v15 = vpop.f32.mrb[2].mxu0  ;;  %v241_v16 = vpop.f32.mrb[2].mxu1 }
  0xe0   :  { %v145_v17 = vpop.f32.mrb[3].mxu0  ;;  %v1880_v18 = vpop.f32.mrb[3].mxu1 }
  0xe1   :  { %v244_v19 = vadd.f32 %v238_v11, %v143_v14  ;;  %v146_v37 = vadd.f32 %v2309_v9, %v145_v17 }
  0xe3   :  { %2052 = vtanh.f32 %v244_v19  ;;  %v1729_v22 = vmul.f32 -1.442695, %v244_v19 }
  0xe5   :  { %2054 = vpow2.f32 %v1729_v22  ;;  %v2352_v59 = vpop.f32.mrb[4].mxu0 }
  0xe6   :  { %v2354_v60 = vpop.f32.mrb[5].mxu0 }
  0xe7   :  { %v2356_v61 = vpop.f32.mrb[6].mxu0 }
  0xe8   :  { %v2358_v62 = vpop.f32.mrb[7].mxu0 }
  0xed   :  { %v2053_v20 = vpop.eup %2052 }
  0xee   :  { %258 = vrot.lane.b32.xlu0 %v2053_v20, %s2186_s22 }
  0xef   :  { %v2055_v23 = vpop.eup %2054 }
  0xf0   :  { %v248_v24 = vadd.f32 1.0, %v2055_v23 }
  0xf2   :  { %253 = vrot.lane.b32.xlu0 %v186_v21, %s2186_s22  ;;  %2056 = vrcp.f32 %v248_v24 }
  0xfc   :  { %v2057_v25 = vpop.eup %2056 }
 0x160   :  { %v259_v26 = vpop.permute.xlu0 %258 }
 0x161   :  { %v261_v27 = vmul.f32 %v2057_v25, %v259_v26  ;;  %v154_v26 = vadd.f32 %v2314_v15, %v2309_v9 }
 0x163   :  { %263 = vrot.lane.b32.xlu1 %v261_v27, %s2186_s22 }
 0x164   :  { %v254_v28 = vpop.permute.xlu0 %253 }
 0x165   :  { %v256_v29 = vmul.f32 %v2057_v25, %v254_v28 }
 0x1d5   :  { %v264_v30 = vpop.permute.xlu1 %263 }
 0x1d6   :  { %v266_v31 = vadd.f32 %v264_v30, %v256_v29 }
 0x1d8   :  { %2058 = vtanh.f32 %v266_v31 }
 0x1e2   :  { %v2059_v32 = vpop.eup %2058 }
 0x1e3   :  { %269 = vrot.lane.b32.xlu1 %v2059_v32, %s2186_s22 }
 0x255   :  { %v270_v33 = vpop.permute.xlu1 %269 }
 0x256   :  { %v272_v34 = vmul.f32 %v2057_v25, %v270_v33 }
 0x258   :  { %v2323_v35 = vpack.c.bf16 %v272_v34, %v272_v34 }
 0x25a   :  { %284 = vrot.lane.b32.xlu0 %v2323_v35, %s2187_s24 }
 0x2cc   :  { %v285_v36 = vpop.permute.xlu0 %284 }
 0x2cd   :  { %1886 = vmatmul.mubr.msk.bf16.vlgmr.msra.gmra.mrb[4].mxu1 %vm95_vm1, %v285_v36 }
 0x2ce   :  { %1898 = vmatpush3.bf16.msra.mxu1 %v2269_v2  ;;  %1901 = vmatprep.mubr.msk.bf16.mxu1 %vm2185_vm0, %v2184_v1 }
 0x2cf   :  { %1899 = vmatprep.subr.bf16.mxu1 %v2184_v1 }
 0x2d2   :  { %1900 = vmatpush3.bf16.msra.mxu1 %v2278_v4 }
 0x2d3   :  { %1913 = vmatprep.subr.bf16.mxu1 %v2184_v1 }
 0x3a0   :  { %v323_v38 = vpop.f32.mrb[4].mxu1 }
 0x3a1   :  { %v329_v39 = vadd.f32 %v323_v38, %v146_v37  ;;  %v1887_v40 = vpop.f32.mrb[5].mxu1 }
 0x3a2   :  { %v326_v41 = vpop.f32.mrb[6].mxu1 }
 0x3a3   :  { %2060 = vtanh.f32 %v329_v39  ;;  %v1888_v42 = vpop.f32.mrb[7].mxu1  ;;  %v1732_v44 = vmul.f32 -1.442695, %v329_v39 }
 0x3a5   :  { %2062 = vpow2.f32 %v1732_v44 }
 0x3ad   :  { %v2061_v43 = vpop.eup %2060 }
 0x3ae   :  { %339 = vrot.lane.b32.xlu1 %v2061_v43, %s2186_s22 }
 0x3af   :  { %v2063_v45 = vpop.eup %2062 }
 0x3b0   :  { %v333_v46 = vadd.f32 1.0, %v2063_v45 }
 0x3b2   :  { %2064 = vrcp.f32 %v333_v46 }
 0x3bc   :  { %v2065_v47 = vpop.eup %2064 }
 0x3bd   :  { %v337_v50 = vmul.f32 %v2065_v47, %v266_v31 }
 0x420   :  { %v340_v48 = vpop.permute.xlu1 %339 }
 0x421   :  { %v342_v49 = vmul.f32 %v2065_v47, %v340_v48 }
 0x423   :  { %344 = vrot.lane.b32.xlu0 %v342_v49, %s2186_s22 }
 0x495   :  { %v345_v51 = vpop.permute.xlu0 %344 }
 0x496   :  { %v347_v52 = vadd.f32 %v345_v51, %v337_v50 }
 0x498   :  { %2066 = vtanh.f32 %v347_v52 }
 0x4a2   :  { %v2067_v55 = vpop.eup %2066 }
 0x4a3   :  { %350 = vrot.lane.b32.xlu1 %v2067_v55, %s2186_s22 }
 0x515   :  { %v351_v56 = vpop.permute.xlu1 %350 }
 0x516   :  { %v353_v57 = vmul.f32 %v2065_v47, %v351_v56  ;;  %v159_v47 = vadd.f32 %v2309_v9, %v2354_v60 }
 0x518   :  { %v2348_v58 = vpack.c.bf16 %v353_v57, %v353_v57 }
 0x51a   :  { %365 = vrot.lane.b32.xlu0 %v2348_v58, %s2187_s24 }
 0x58c   :  { %v366_v63 = vpop.permute.xlu0 %365 }
 0x58d   :  { %1894 = vmatmul.mubr.msk.bf16.vlgmr.msra.gmra.mrb[8].mxu0 %vm95_vm1, %v366_v63 }
 0x58e   :  { %1906 = vmatpush3.bf16.msra.mxu0 %v2269_v2  ;;  %1909 = vmatprep.mubr.msk.bf16.mxu0 %vm2185_vm0, %v2184_v1 }
 0x58f   :  { %1907 = vmatprep.subr.bf16.mxu0 %v2184_v1 }
 0x592   :  { %1908 = vmatpush3.bf16.msra.mxu0 %v2278_v4 }
 0x593   :  { %1921 = vmatprep.subr.bf16.mxu0 %v2184_v1 }
 0x660   :  { %v404_v3 = vpop.f32.mrb[8].mxu0 }
 0x661   :  { %v410_v5 = vadd.f32 %v404_v3, %v151_v0  ;;  %v1895_v6 = vpop.f32.mrb[9].mxu0 }
 0x662   :  { %v407_v7 = vpop.f32.mrb[10].mxu0 }
 0x663   :  { %2068 = vtanh.f32 %v410_v5  ;;  %v1896_v8 = vpop.f32.mrb[11].mxu0  ;;  %v1735_v12 = vmul.f32 -1.442695, %v410_v5 }
 0x665   :  { %2070 = vpow2.f32 %v1735_v12 }
 0x66d   :  { %v2069_v11 = vpop.eup %2068 }
 0x66e   :  { %420 = vrot.lane.b32.xlu1 %v2069_v11, %s2186_s22 }
 0x66f   :  { %v2071_v13 = vpop.eup %2070 }
 0x670   :  { %v414_v14 = vadd.f32 1.0, %v2071_v13  ;;  %v162_v13 = vadd.f32 %v2309_v9, %v2358_v62 }
 0x672   :  { %2072 = vrcp.f32 %v414_v14 }
 0x67c   :  { %v2073_v16 = vpop.eup %2072 }
 0x67d   :  { %v418_v10 = vmul.f32 %v2073_v16, %v347_v52 }
 0x6e0   :  { %v421_v17 = vpop.permute.xlu1 %420 }
 0x6e1   :  { %v423_v18 = vmul.f32 %v2073_v16, %v421_v17 }
 0x6e3   :  { %425 = vrot.lane.b32.xlu0 %v423_v18, %s2186_s22 }
 0x755   :  { %v426_v19 = vpop.permute.xlu0 %425 }
 0x756   :  { %v428_v20 = vadd.f32 %v426_v19, %v418_v10 }
 0x758   :  { %2074 = vtanh.f32 %v428_v20 }
 0x762   :  { %v2075_v21 = vpop.eup %2074 }
 0x763   :  { %431 = vrot.lane.b32.xlu1 %v2075_v21, %s2186_s22 }
 0x7d5   :  { %v432_v22 = vpop.permute.xlu1 %431 }
 0x7d6   :  { %v434_v23 = vmul.f32 %v2073_v16, %v432_v22 }
 0x7d8   :  { %v2372_v24 = vpack.c.bf16 %v434_v23, %v434_v23 }
 0x7da   :  { %446 = vrot.lane.b32.xlu0 %v2372_v24, %s2187_s24 }
 0x84c   :  { %v447_v25 = vpop.permute.xlu0 %446 }
 0x84d   :  { %1902 = vmatmul.mubr.msk.bf16.vlgmr.msra.gmra.mrb[8].mxu1 %vm95_vm1, %v447_v25 }
 0x84e   :  { %1914 = vmatpush3.bf16.msra.mxu1 %v2269_v2  ;;  %1917 = vmatprep.mubr.msk.bf16.mxu1 %vm2185_vm0, %v2184_v1 }
 0x84f   :  { %1915 = vmatprep.subr.bf16.mxu1 %v2184_v1 }
 0x852   :  { %1916 = vmatpush3.bf16.msra.mxu1 %v2278_v4 }
 0x853   :  { %1929 = vmatprep.subr.bf16.mxu1 %v2184_v1 }
 0x920   :  { %v485_v27 = vpop.f32.mrb[8].mxu1 }
 0x921   :  { %v491_v28 = vadd.f32 %v485_v27, %v154_v26  ;;  %v1903_v29 = vpop.f32.mrb[9].mxu1 }
 0x922   :  { %v488_v30 = vpop.f32.mrb[10].mxu1 }
 0x923   :  { %2076 = vtanh.f32 %v491_v28  ;;  %v1904_v31 = vpop.f32.mrb[11].mxu1  ;;  %v1738_v33 = vmul.f32 -1.442695, %v491_v28 }
 0x925   :  { %2078 = vpow2.f32 %v1738_v33 }
 0x92d   :  { %v2077_v32 = vpop.eup %2076 }
 0x92e   :  { %501 = vrot.lane.b32.xlu1 %v2077_v32, %s2186_s22  ;;  %v167_v32 = vadd.f32 %v2352_v59, %v2309_v9 }
 0x92f   :  { %v2079_v34 = vpop.eup %2078 }
 0x930   :  { %v495_v36 = vadd.f32 1.0, %v2079_v34 }
 0x932   :  { %2080 = vrcp.f32 %v495_v36 }
 0x93c   :  { %v2081_v37 = vpop.eup %2080 }
 0x93d   :  { %v499_v15 = vmul.f32 %v2081_v37, %v428_v20 }
 0x9a0   :  { %v502_v38 = vpop.permute.xlu1 %501 }
 0x9a1   :  { %v504_v39 = vmul.f32 %v2081_v37, %v502_v38 }
 0x9a3   :  { %506 = vrot.lane.b32.xlu0 %v504_v39, %s2186_s22 }
 0xa15   :  { %v507_v40 = vpop.permute.xlu0 %506 }
 0xa16   :  { %v509_v41 = vadd.f32 %v507_v40, %v499_v15 }
 0xa18   :  { %2082 = vtanh.f32 %v509_v41 }
 0xa22   :  { %v2083_v42 = vpop.eup %2082 }
 0xa23   :  { %512 = vrot.lane.b32.xlu1 %v2083_v42, %s2186_s22 }
 0xa95   :  { %v513_v43 = vpop.permute.xlu1 %512 }
 0xa96   :  { %v515_v44 = vmul.f32 %v2081_v37, %v513_v43 }
 0xa98   :  { %v2388_v45 = vpack.c.bf16 %v515_v44, %v515_v44 }
 0xa9a   :  { %527 = vrot.lane.b32.xlu0 %v2388_v45, %s2187_s24 }
 0xb0c   :  { %v528_v46 = vpop.permute.xlu0 %527 }
 0xb0d   :  { %1910 = vmatmul.mubr.msk.bf16.vlgmr.msra.gmra.mrb[12].mxu0 %vm95_vm1, %v528_v46 }
 0xb0e   :  { %1922 = vmatpush3.bf16.msra.mxu0 %v2269_v2  ;;  %1925 = vmatprep.mubr.msk.bf16.mxu0 %vm2185_vm0, %v2184_v1 }
 0xb0f   :  { %1923 = vmatprep.subr.bf16.mxu0 %v2184_v1 }
 0xb12   :  { %1924 = vmatpush3.bf16.msra.mxu0 %v2278_v4 }
 0xbe0   :  { %v566_v48 = vpop.f32.mrb[12].mxu0 }
 0xbe1   :  { %v572_v49 = vadd.f32 %v566_v48, %v159_v47  ;;  %v1911_v50 = vpop.f32.mrb[13].mxu0 }
 0xbe2   :  { %v569_v51 = vpop.f32.mrb[14].mxu0  ;;  %v2044_v50 = vld [vmem:[%s2667_s4] sm:$0xff]  }
 0xbe3   :  { %2084 = vtanh.f32 %v572_v49  ;;  %v1912_v52 = vpop.f32.mrb[15].mxu0  ;;  %v1741_v54 = vmul.f32 -1.442695, %v572_v49  ;;  %1937 = vmatprep.subr.bf16.mxu0 %v2044_v50 }
 0xbe5   :  { %2086 = vpow2.f32 %v1741_v54 }
 0xbed   :  { %v2085_v53 = vpop.eup %2084 }
 0xbee   :  { %582 = vrot.lane.b32.xlu1 %v2085_v53, %s2186_s22 }
 0xbef   :  { %v2087_v55 = vpop.eup %2086 }
 0xbf0   :  { %v576_v56 = vadd.f32 1.0, %v2087_v55 }
 0xbf2   :  { %2088 = vrcp.f32 %v576_v56 }
 0xbfc   :  { %v2089_v57 = vpop.eup %2088 }
 0xbfd   :  { %v580_v60 = vmul.f32 %v2089_v57, %v509_v41 }
 0xc60   :  { %v583_v63 = vpop.permute.xlu1 %582 }
 0xc61   :  { %v585_v0 = vmul.f32 %v2089_v57, %v583_v63  ;;  %v1764_v63 = vld [vmem:[%s2666_s8 + $0x8] sm:$0xff] }
 0xc63   :  { %587 = vrot.lane.b32.xlu0 %v585_v0, %s2186_s22 }
 0xcd5   :  { %v588_v3 = vpop.permute.xlu0 %587 }
 0xcd6   :  { %v590_v5 = vadd.f32 %v588_v3, %v580_v60  ;;  %v1763_v60 = vld [vmem:[%s2664_s7 + $0x8] sm:$0xff] }
 0xcd7   :  { %v1004_v3 = vpack.c.bf16 %v1763_v60, %v1763_v60 }
 0xcd8   :  { %2090 = vtanh.f32 %v590_v5 }
 0xce2   :  { %v2091_v6 = vpop.eup %2090 }
 0xce3   :  { %593 = vrot.lane.b32.xlu1 %v2091_v6, %s2186_s22 }
 0xd55   :  { %v594_v7 = vpop.permute.xlu1 %593 }
 0xd56   :  { %v596_v8 = vmul.f32 %v2089_v57, %v594_v7  ;;  %v2467_v57 = vld [vmem:[%s2668_s5 + $0x8] sm:$0xff]  }
 0xd58   :  { %v2403_v11 = vpack.c.bf16 %v596_v8, %v596_v8 }
 0xd5a   :  { %608 = vrot.lane.b32.xlu0 %v2403_v11, %s2187_s24 }
 0xdcc   :  { %v609_v12 = vpop.permute.xlu0 %608 }
 0xdcd   :  { %1918 = vmatmul.mubr.msk.bf16.vlgmr.msra.gmra.mrb[12].mxu1 %vm95_vm1, %v609_v12  ;;  %v170_v12 = vadd.f32 %v2356_v61, %v2309_v9 }
 0xdce   :  { %1930 = vmatpush3.bf16.msra.mxu1 %v2269_v2  ;;  %1933 = vmatprep.mubr.msk.bf16.mxu1 %vm2185_vm0, %v2184_v1 }
 0xdcf   :  { %1931 = vmatprep.subr.bf16.mxu1 %v2184_v1 }
 0xdd2   :  { %1932 = vmatpush3.bf16.msra.mxu1 %v2278_v4 }
 0xdd3   :  { %1949 = vmatprep.subr.bf16.mxu1 %v2184_v1 }
 0xea0   :  { %v647_v14 = vpop.f32.mrb[12].mxu1 }
 0xea1   :  { %v653_v16 = vadd.f32 %v647_v14, %v162_v13  ;;  %v1919_v17 = vpop.f32.mrb[13].mxu1 }
 0xea2   :  { %v650_v18 = vpop.f32.mrb[14].mxu1 }
 0xea3   :  { %2092 = vtanh.f32 %v653_v16  ;;  %v1920_v10 = vpop.f32.mrb[15].mxu1  ;;  %v1744_v2 = vmul.f32 -1.442695, %v653_v16 }
 0xea4   :  { %v2503_v10 = vld [vmem:[%s2669_s6] ss:$0 sm:$0xff] }
 0xea5   :  { %2094 = vpow2.f32 %v1744_v2 }
 0xead   :  { %v2093_v19 = vpop.eup %2092 }
 0xeae   :  { %663 = vrot.lane.b32.xlu1 %v2093_v19, %s2186_s22 }
 0xeaf   :  { %v2095_v20 = vpop.eup %2094 }
 0xeb0   :  { %v657_v21 = vadd.f32 1.0, %v2095_v20 }
 0xeb2   :  { %2096 = vrcp.f32 %v657_v21 }
 0xebc   :  { %v2097_v4 = vpop.eup %2096 }
 0xebd   :  { %v661_v62 = vmul.f32 %v2097_v4, %v590_v5 }
 0xf20   :  { %v664_v22 = vpop.permute.xlu1 %663 }
 0xf21   :  { %v666_v23 = vmul.f32 %v2097_v4, %v664_v22 }
 0xf23   :  { %668 = vrot.lane.b32.xlu0 %v666_v23, %s2186_s22 }
 0xf95   :  { %v669_v25 = vpop.permute.xlu0 %668 }
 0xf96   :  { %v671_v26 = vadd.f32 %v669_v25, %v661_v62 }
 0xf98   :  { %2098 = vtanh.f32 %v671_v26 }
 0xfa2   :  { %v2099_v27 = vpop.eup %2098 }
 0xfa3   :  { %674 = vrot.lane.b32.xlu1 %v2099_v27, %s2186_s22 }
0x1015   :  { %v675_v28 = vpop.permute.xlu1 %674 }
0x1016   :  { %v677_v29 = vmul.f32 %v2097_v4, %v675_v28 }
0x1018   :  { %v2419_v30 = vpack.c.bf16 %v677_v29, %v677_v29 }
0x101a   :  { %689 = vrot.lane.b32.xlu0 %v2419_v30, %s2187_s24 }
0x108c   :  { %v690_v31 = vpop.permute.xlu0 %689 }
0x108d   :  { %1926 = vmatmul.mubr.msk.bf16.vlgmr.msra.gmra.mrb[16].mxu0 %vm95_vm1, %v690_v31 }
0x108e   :  { %1938 = vmatpush3.bf16.msra.mxu0 %v2044_v50 }
0x1160   :  { %v728_v33 = vpop.f32.mrb[16].mxu0 }
0x1161   :  { %v734_v34 = vadd.f32 %v728_v33, %v167_v32  ;;  %v1927_v36 = vpop.f32.mrb[17].mxu0 }
0x1162   :  { %v731_v37 = vpop.f32.mrb[18].mxu0 }
0x1163   :  { %2100 = vtanh.f32 %v734_v34  ;;  %v1928_v38 = vpop.f32.mrb[19].mxu0  ;;  %v1747_v15 = vmul.f32 -1.442695, %v734_v34 }
0x1165   :  { %2102 = vpow2.f32 %v1747_v15 }
0x116d   :  { %v2101_v39 = vpop.eup %2100 }
0x116e   :  { %744 = vrot.lane.b32.xlu1 %v2101_v39, %s2186_s22 }
0x116f   :  { %v2103_v40 = vpop.eup %2102 }
0x1170   :  { %v738_v41 = vadd.f32 1.0, %v2103_v40 }
0x1172   :  { %2104 = vrcp.f32 %v738_v41 }
0x117c   :  { %v2105_v42 = vpop.eup %2104 }
0x117d   :  { %v742_v59 = vmul.f32 %v2105_v42, %v671_v26 }
0x11e0   :  { %v745_v43 = vpop.permute.xlu1 %744 }
0x11e1   :  { %v747_v44 = vmul.f32 %v2105_v42, %v745_v43 }
0x11e3   :  { %749 = vrot.lane.b32.xlu0 %v747_v44, %s2186_s22 }
0x11e7   :  { %277 = vrot.lane.b32.xlu0 %v2323_v35, %s2187_s24  ;;  %v2045_v35 = vld [vmem:[%s2667_s4 + $0x8] sm:$0xff]  }
0x11e8   :  { %1939 = vmatprep.subr.bf16.mxu0 %v2045_v35 }
0x11e9   :  { %1940 = vmatpush3.bf16.msra.mxu0 %v2045_v35 }
0x11ea   :  { %1965 = vmatprep.subr.bf16.mxu0 %v2184_v1 }
0x11eb   :  { %439 = vrot.lane.b32.xlu0 %v2372_v24, %s2187_s24 }
0x1255   :  { %v750_v46 = vpop.permute.xlu0 %749 }
0x1256   :  { %v2432_v47 = vadd.f32 %v750_v46, %v742_v59 }
0x1258   :  { %2106 = vtanh.f32 %v2432_v47 }
0x1259   :  { %v278_v48 = vpop.permute.xlu0 %277 }
0x125a   :  { %281 = vst.msk [vmem:[#allocation3] sm:$0xf] %vm280_vm2, %v278_v48 }
0x125d   :  { %v440_v49 = vpop.permute.xlu0 %439 }
0x125e   :  { %443 = vst.msk [vmem:[#allocation3 + $0x8] sm:$0xf] %vm280_vm2, %v440_v49 }
0x1262   :  { %v2107_v24 = vpop.eup %2106 }
0x1263   :  { %755 = vrot.lane.b32.xlu1 %v2107_v24, %s2186_s22 }
0x1267   :  { %358 = vrot.lane.b32.xlu1 %v2348_v58, %s2187_s24 }
0x126b   :  { %520 = vrot.lane.b32.xlu1 %v2388_v45, %s2187_s24  ;;  %v2459_v45 = vld [vmem:[%s2668_s5] sm:$0xff]  }
0x12d5   :  { %v756_v51 = vpop.permute.xlu1 %755 }
0x12d6   :  { %v758_v52 = vmul.f32 %v2105_v42, %v756_v51 }
0x12d8   :  { %v2449_v53 = vpack.c.bf16 %v758_v52, %v758_v52 }
0x12d9   :  { %v359_v54 = vpop.permute.xlu1 %358 }
0x12da   :  { %362 = vst.msk [vmem:[#allocation3 + $0x4] sm:$0xf] %vm280_vm2, %v359_v54  ;;  %770 = vrot.lane.b32.xlu0 %v2449_v53, %s2187_s24 }
0x12dd   :  { %v521_v55 = vpop.permute.xlu1 %520 }
0x12de   :  { %524 = vst.msk [vmem:[#allocation3 + $0xc] sm:$0xf] %vm280_vm2, %v521_v55  ;;  %1069 = vrot.lane.b32.xlu0 %v1764_v63, %s2186_s22 }
0x12e1   :  { %v2046_v56 = vld [vmem:[#allocation3] sm:$0xff]  }
0x12e2   :  { %1941 = vmatprep.mubr.msk.bf16.mxu0 %vm95_vm1, %v2046_v56 }
0x12e5   :  { %v2047_v58 = vld [vmem:[#allocation3 + $0x8] sm:$0xff]  }
0x12e6   :  { %1942 = vmatmul.mubr.msk.bf16.vlgmr.msra.gmra.mrb[20].mxu0 %vm95_vm1, %v2047_v58 }
0x12e7   :  { %1966 = vmatpush3.bf16.msra.mxu0 %v2459_v45 }
0x12e8   :  { %1967 = vmatprep.subr.bf16.mxu0 %v2184_v1 }
0x12eb   :  { %1968 = vmatpush3.bf16.msra.mxu0 %v2467_v57 }
0x12ec   :  { %1981 = vmatprep.subr.bf16.mxu0 %v2184_v1 }
0x134c   :  { %v771_v0 = vpop.permute.xlu0 %770 }
0x134d   :  { %1934 = vmatmul.mubr.msk.bf16.vlgmr.msra.gmra.mrb[16].mxu1 %vm95_vm1, %v771_v0 }
0x134e   :  { %1950 = vmatpush3.bf16.msra.mxu1 %v2459_v45  ;;  %1953 = vmatprep.mubr.msk.bf16.mxu1 %vm2185_vm0, %v2184_v1 }
0x134f   :  { %1951 = vmatprep.subr.bf16.mxu1 %v2184_v1 }
0x1350   :  { %v1070_v28 = vpop.permute.xlu0 %1069 }
0x1352   :  { %1952 = vmatpush3.bf16.msra.mxu1 %v2467_v57 }
0x1353   :  { %1957 = vmatprep.subr.bf16.mxu1 %v2184_v1 }
0x1355   :  { %1954 = vmatmul.mubr.msk.bf16.vlgmr.msra.gmra.mrb[20].mxu1 %vm95_vm1, %v1004_v3 }
0x1356   :  { %1958 = vmatpush3.bf16.msra.mxu1 %v2459_v45  ;;  %1961 = vmatprep.mubr.msk.bf16.mxu1 %vm2185_vm0, %v2184_v1 }
0x1357   :  { %1959 = vmatprep.subr.bf16.mxu1 %v2184_v1 }
0x135a   :  { %1960 = vmatpush3.bf16.msra.mxu1 %v2467_v57 }
0x135b   :  { %1973 = vmatprep.subr.bf16.mxu1 %v2184_v1 }
0x13b9   :  { %v2492_v5 = vpop.f32.mrb[20].mxu0 }
0x13ba   :  { %v956_v6 = vpop.f32.mrb[21].mxu0 }
0x13bb   :  { %v2494_v7 = vpop.f32.mrb[22].mxu0  ;;  %v957_v19 = vadd.f32 %v2503_v10, %v956_v6 }
0x13bc   :  { %v2496_v8 = vpop.f32.mrb[23].mxu0 }
0x13bd   :  { %v960_v24 = vadd.f32 %v2503_v10, %v2496_v8 }
0x1420   :  { %v809_v13 = vpop.f32.mrb[16].mxu1 }
0x1421   :  { %v815_v14 = vadd.f32 %v809_v13, %v170_v12  ;;  %v1935_v16 = vpop.f32.mrb[17].mxu1 }
0x1422   :  { %v812_v17 = vpop.f32.mrb[18].mxu1 }
0x1423   :  { %v1936_v18 = vpop.f32.mrb[19].mxu1  ;;  %v1750_v36 = vmul.f32 -1.442695, %v815_v14 }
0x1428   :  { %v1054_v2 = vpop.f32.mrb[20].mxu1 }
0x1429   :  { %v1060_v20 = vadd.f32 %v1054_v2, %v957_v19  ;;  %v1955_v21 = vpop.f32.mrb[21].mxu1 }
0x142a   :  { %v1057_v4 = vpop.f32.mrb[22].mxu1 }
0x142b   :  { %2108 = vtanh.f32 %v1060_v20  ;;  %v1956_v22 = vpop.f32.mrb[23].mxu1  ;;  %v1768_v9 = vmul.f32 -1.442695, %v1060_v20 }
0x142d   :  { %2110 = vpow2.f32 %v1768_v9 }
0x1435   :  { %v2109_v23 = vpop.eup %2108 }
0x1436   :  { %1074 = vrot.lane.b32.xlu1 %v2109_v23, %s2186_s22 }
0x1437   :  { %v2111_v61 = vpop.eup %2110 }
0x1438   :  { %v1064_v62 = vadd.f32 1.0, %v2111_v61 }
0x143a   :  { %2112 = vrcp.f32 %v1064_v62  ;;  %v965_v62 = vadd.f32 %v2492_v5, %v2503_v10 }
0x1444   :  { %v2113_v25 = vpop.eup %2112 }
0x1445   :  { %v1072_v29 = vmul.f32 %v2113_v25, %v1070_v28 }
0x14a8   :  { %v1075_v26 = vpop.permute.xlu1 %1074 }
0x14a9   :  { %v1077_v27 = vmul.f32 %v2113_v25, %v1075_v26 }
0x14ab   :  { %1079 = vrot.lane.b32.xlu1 %v1077_v27, %s2186_s22 }
0x151d   :  { %v1080_v31 = vpop.permute.xlu1 %1079 }
0x151e   :  { %v1082_v32 = vadd.f32 %v1080_v31, %v1072_v29 }
0x1520   :  { %2114 = vtanh.f32 %v1082_v32 }
0x1521   :  { %2116 = vtanh.f32 %v815_v14 }
0x1522   :  { %2118 = vpow2.f32 %v1750_v36 }
0x152a   :  { %v2115_v33 = vpop.eup %2114 }
0x152b   :  { %1085 = vrot.lane.b32.xlu0 %v2115_v33, %s2186_s22  ;;  %v2117_v34 = vpop.eup %2116 }
0x152c   :  { %v2119_v37 = vpop.eup %2118 }
0x152d   :  { %v819_v38 = vadd.f32 1.0, %v2119_v37 }
0x152f   :  { %825 = vrot.lane.b32.xlu0 %v2117_v34, %s2186_s22  ;;  %2120 = vrcp.f32 %v819_v38 }
0x1539   :  { %v2121_v41 = vpop.eup %2120 }
0x153a   :  { %v823_v59 = vmul.f32 %v2121_v41, %v2432_v47 }
0x159d   :  { %v1086_v39 = vpop.permute.xlu0 %1085 }
0x159e   :  { %v1088_v15 = vmul.f32 %v2113_v25, %v1086_v39 }
0x15a0   :  { %v1090_v40 = vpack.c.bf16 %v1088_v15, %v1088_v15 }
0x15a1   :  { %v826_v42 = vpop.permute.xlu0 %825 }
0x15a2   :  { %v828_v43 = vmul.f32 %v2121_v41, %v826_v42  ;;  %1092 = vrot.lane.b32.xlu1 %v1090_v40, %s2187_s24 }
0x15a4   :  { %830 = vrot.lane.b32.xlu0 %v828_v43, %s2186_s22 }
0x1614   :  { %v1093_v44 = vpop.permute.xlu1 %1092 }
0x1615   :  { %1962 = vmatmul.mubr.msk.bf16.vlgmr.msra.gmra.mrb[24].mxu1 %vm95_vm1, %v1093_v44 }
0x1616   :  { %v831_v46 = vpop.permute.xlu0 %830  ;;  %1974 = vmatpush3.bf16.msra.mxu1 %v2459_v45  ;;  %1977 = vmatprep.mubr.msk.bf16.mxu1 %vm2185_vm0, %v2184_v1 }
0x1617   :  { %v2517_v48 = vadd.f32 %v831_v46, %v823_v59  ;;  %1975 = vmatprep.subr.bf16.mxu1 %v2184_v1  ;;  %v968_v59 = vadd.f32 %v2494_v7, %v2503_v10 }
0x1619   :  { %2122 = vtanh.f32 %v2517_v48 }
0x161a   :  { %1976 = vmatpush3.bf16.msra.mxu1 %v2467_v57 }
0x161b   :  { %1989 = vmatprep.subr.bf16.mxu1 %v2184_v1 }
0x1623   :  { %v2123_v49 = vpop.eup %2122 }
0x1624   :  { %836 = vrot.lane.b32.xlu0 %v2123_v49, %s2186_s22 }
0x1628   :  { %601 = vrot.lane.b32.xlu0 %v2403_v11, %s2187_s24 }
0x162c   :  { %763 = vrot.lane.b32.xlu0 %v2449_v53, %s2187_s24 }
0x1696   :  { %v837_v47 = vpop.permute.xlu0 %836 }
0x1697   :  { %v2535_v14 = vmul.f32 %v2121_v41, %v837_v47 }
0x1699   :  { %v1795_v16 = vpack.c.bf16 %v2535_v14, %v2535_v14 }
0x169a   :  { %v602_v50 = vpop.permute.xlu0 %601 }
0x169b   :  { %605 = vst.msk [vmem:[#allocation3 + $0x10] sm:$0xf] %vm280_vm2, %v602_v50 }
0x169e   :  { %v764_v35 = vpop.permute.xlu0 %763 }
0x169f   :  { %767 = vst.msk [vmem:[#allocation3 + $0x18] sm:$0xf] %vm280_vm2, %v764_v35 }
0x16e8   :  { %v1131_v51 = vpop.f32.mrb[24].mxu1 }
0x16e9   :  { %v1137_v52 = vadd.f32 %v1131_v51, %v960_v24  ;;  %v1963_v54 = vpop.f32.mrb[25].mxu1 }
0x16ea   :  { %v1134_v55 = vpop.f32.mrb[26].mxu1 }
0x16eb   :  { %2124 = vtanh.f32 %v1137_v52  ;;  %v1964_v56 = vpop.f32.mrb[27].mxu1  ;;  %v1770_v53 = vmul.f32 -1.442695, %v1137_v52 }
0x16ed   :  { %2126 = vpow2.f32 %v1770_v53 }
0x16f5   :  { %v2125_v11 = vpop.eup %2124 }
0x16f6   :  { %1147 = vrot.lane.b32.xlu1 %v2125_v11, %s2186_s22 }
0x16f7   :  { %v2127_v58 = vpop.eup %2126 }
0x16f8   :  { %v1141_v63 = vadd.f32 1.0, %v2127_v58 }
0x16fa   :  { %2128 = vrcp.f32 %v1141_v63 }
0x1704   :  { %v2129_v0 = vpop.eup %2128 }
0x1705   :  { %v1145_v6 = vmul.f32 %v2129_v0, %v1082_v32 }
0x1768   :  { %v1148_v60 = vpop.permute.xlu1 %1147 }
0x1769   :  { %v1150_v3 = vmul.f32 %v2129_v0, %v1148_v60 }
0x176b   :  { %1152 = vrot.lane.b32.xlu1 %v1150_v3, %s2186_s22 }
0x17dd   :  { %v1153_v8 = vpop.permute.xlu1 %1152 }
0x17de   :  { %v1155_v12 = vadd.f32 %v1153_v8, %v1145_v6 }
0x17e0   :  { %2130 = vtanh.f32 %v1155_v12 }
0x17ea   :  { %v2131_v13 = vpop.eup %2130 }
0x17eb   :  { %1158 = vrot.lane.b32.xlu1 %v2131_v13, %s2186_s22 }
0x17ef   :  { %682 = vrot.lane.b32.xlu1 %v2419_v30, %s2187_s24 }
0x17f3   :  { %844 = vrot.lane.b32.xlu1 %v1795_v16, %s2187_s24 }
0x185d   :  { %v1159_v17 = vpop.permute.xlu1 %1158 }
0x185e   :  { %v1161_v18 = vmul.f32 %v2129_v0, %v1159_v17 }
0x1860   :  { %v1163_v19 = vpack.c.bf16 %v1161_v18, %v1161_v18 }
0x1861   :  { %v683_v2 = vpop.permute.xlu1 %682 }
0x1862   :  { %686 = vst.msk [vmem:[#allocation3 + $0x14] sm:$0xf] %vm280_vm2, %v683_v2  ;;  %1165 = vrot.lane.b32.xlu0 %v1163_v19, %s2187_s24 }
0x1865   :  { %v845_v20 = vpop.permute.xlu1 %844 }
0x1866   :  { %848 = vst.msk [vmem:[#allocation3 + $0x1c] sm:$0xf] %vm280_vm2, %v845_v20 }
0x1869   :  { %v2050_v21 = vld [vmem:[#allocation3 + $0x10] sm:$0xff]  }
0x186a   :  { %1945 = vmatprep.mubr.msk.bf16.mxu0 %vm95_vm1, %v2050_v21 }
0x186d   :  { %v2051_v30 = vld [vmem:[#allocation3 + $0x18] sm:$0xff]  }
0x186e   :  { %1946 = vmatmul.mubr.msk.bf16.gmra.mrb[24].mxu0 %vm95_vm1, %v2051_v30 }
0x186f   :  { %1969 = vmatprep.mubr.msk.bf16.mxu0 %vm2185_vm0, %v2184_v1 }
0x18d4   :  { %v1166_v4 = vpop.permute.xlu0 %1165 }
0x18d5   :  { %1970 = vmatmul.mubr.msk.bf16.vlgmr.msra.gmra.mrb[28].mxu0 %vm95_vm1, %v1166_v4 }
0x18d6   :  { %1982 = vmatpush3.bf16.msra.mxu0 %v2459_v45  ;;  %1985 = vmatprep.mubr.msk.bf16.mxu0 %vm2185_vm0, %v2184_v1 }
0x18d7   :  { %1983 = vmatprep.subr.bf16.mxu0 %v2184_v1 }
0x18da   :  { %1984 = vmatpush3.bf16.msra.mxu0 %v2467_v57 }
0x18db   :  { %1997 = vmatprep.subr.bf16.mxu0 %v2184_v1 }
0x1941   :  { %v2556_v22 = vpop.f32.mrb[24].mxu0 }
0x1942   :  { %v2558_v23 = vpop.f32.mrb[25].mxu0 }
0x1943   :  { %v2560_v9 = vpop.f32.mrb[26].mxu0  ;;  %v973_v8 = vadd.f32 %v2503_v10, %v2558_v23 }
0x1944   :  { %v2562_v61 = vpop.f32.mrb[27].mxu0 }
0x19a8   :  { %v1204_v25 = vpop.f32.mrb[28].mxu0 }
0x19a9   :  { %v1210_v26 = vadd.f32 %v1204_v25, %v965_v62  ;;  %v1971_v27 = vpop.f32.mrb[29].mxu0 }
0x19aa   :  { %v1207_v28 = vpop.f32.mrb[30].mxu0 }
0x19ab   :  { %2132 = vtanh.f32 %v1210_v26  ;;  %v1972_v29 = vpop.f32.mrb[31].mxu0  ;;  %v1772_v32 = vmul.f32 -1.442695, %v1210_v26 }
0x19ad   :  { %2134 = vpow2.f32 %v1772_v32 }
0x19b5   :  { %v2133_v31 = vpop.eup %2132 }
0x19b6   :  { %1220 = vrot.lane.b32.xlu1 %v2133_v31, %s2186_s22 }
0x19b7   :  { %v2135_v33 = vpop.eup %2134 }
0x19b8   :  { %v1214_v34 = vadd.f32 1.0, %v2135_v33  ;;  %v976_v33 = vadd.f32 %v2503_v10, %v2562_v61 }
0x19ba   :  { %2136 = vrcp.f32 %v1214_v34 }
0x19c4   :  { %v2137_v36 = vpop.eup %2136 }
0x19c5   :  { %v1218_v5 = vmul.f32 %v2137_v36, %v1155_v12 }
0x1a28   :  { %v1221_v37 = vpop.permute.xlu1 %1220 }
0x1a29   :  { %v1223_v38 = vmul.f32 %v2137_v36, %v1221_v37 }
0x1a2b   :  { %1225 = vrot.lane.b32.xlu0 %v1223_v38, %s2186_s22 }
0x1a9d   :  { %v1226_v39 = vpop.permute.xlu0 %1225 }
0x1a9e   :  { %v1228_v15 = vadd.f32 %v1226_v39, %v1218_v5 }
0x1aa0   :  { %2138 = vtanh.f32 %v1228_v15 }
0x1aaa   :  { %v2139_v40 = vpop.eup %2138 }
0x1aab   :  { %1231 = vrot.lane.b32.xlu1 %v2139_v40, %s2186_s22 }
0x1b1d   :  { %v1232_v41 = vpop.permute.xlu1 %1231 }
0x1b1e   :  { %v1234_v42 = vmul.f32 %v2137_v36, %v1232_v41 }
0x1b20   :  { %v1236_v43 = vpack.c.bf16 %v1234_v42, %v1234_v42 }
0x1b22   :  { %1238 = vrot.lane.b32.xlu0 %v1236_v43, %s2187_s24 }
0x1b94   :  { %v1239_v44 = vpop.permute.xlu0 %1238 }
0x1b95   :  { %1978 = vmatmul.mubr.msk.bf16.vlgmr.msra.gmra.mrb[28].mxu1 %vm95_vm1, %v1239_v44 }
0x1b96   :  { %1990 = vmatpush3.bf16.msra.mxu1 %v2459_v45  ;;  %1993 = vmatprep.mubr.msk.bf16.mxu1 %vm2185_vm0, %v2184_v1 }
0x1b97   :  { %1991 = vmatprep.subr.bf16.mxu1 %v2184_v1 }
0x1b9a   :  { %1992 = vmatpush3.bf16.msra.mxu1 %v2467_v57 }
0x1b9b   :  { %2005 = vmatprep.subr.bf16.mxu1 %v2184_v1 }
0x1c68   :  { %v1277_v46 = vpop.f32.mrb[28].mxu1 }
0x1c69   :  { %v1283_v49 = vadd.f32 %v1277_v46, %v968_v59  ;;  %v1979_v47 = vpop.f32.mrb[29].mxu1 }
0x1c6a   :  { %v1280_v50 = vpop.f32.mrb[30].mxu1 }
0x1c6b   :  { %2140 = vtanh.f32 %v1283_v49  ;;  %v1980_v35 = vpop.f32.mrb[31].mxu1  ;;  %v1774_v51 = vmul.f32 -1.442695, %v1283_v49 }
0x1c6c   :  { %v981_v35 = vadd.f32 %v2556_v22, %v2503_v10 }
0x1c6d   :  { %2142 = vpow2.f32 %v1774_v51 }
0x1c75   :  { %v2141_v24 = vpop.eup %2140 }
0x1c76   :  { %1293 = vrot.lane.b32.xlu1 %v2141_v24, %s2186_s22 }
0x1c77   :  { %v2143_v52 = vpop.eup %2142 }
0x1c78   :  { %v1287_v54 = vadd.f32 1.0, %v2143_v52 }
0x1c7a   :  { %2144 = vrcp.f32 %v1287_v54 }
0x1c84   :  { %v2145_v55 = vpop.eup %2144 }
0x1c85   :  { %v1291_v7 = vmul.f32 %v2145_v55, %v1228_v15 }
0x1ce8   :  { %v1294_v56 = vpop.permute.xlu1 %1293 }
0x1ce9   :  { %v1296_v11 = vmul.f32 %v2145_v55, %v1294_v56 }
0x1ceb   :  { %1298 = vrot.lane.b32.xlu0 %v1296_v11, %s2186_s22 }
0x1d5d   :  { %v1299_v53 = vpop.permute.xlu0 %1298 }
0x1d5e   :  { %v1301_v58 = vadd.f32 %v1299_v53, %v1291_v7 }
0x1d60   :  { %2146 = vtanh.f32 %v1301_v58 }
0x1d6a   :  { %v2147_v63 = vpop.eup %2146 }
0x1d6b   :  { %1304 = vrot.lane.b32.xlu1 %v2147_v63, %s2186_s22 }
0x1ddd   :  { %v1305_v0 = vpop.permute.xlu1 %1304 }
0x1dde   :  { %v1307_v60 = vmul.f32 %v2145_v55, %v1305_v0 }
0x1de0   :  { %v1309_v3 = vpack.c.bf16 %v1307_v60, %v1307_v60 }
0x1de2   :  { %1311 = vrot.lane.b32.xlu0 %v1309_v3, %s2187_s24 }
0x1e54   :  { %v1312_v6 = vpop.permute.xlu0 %1311 }
0x1e55   :  { %1986 = vmatmul.mubr.msk.bf16.vlgmr.msra.gmra.mrb[32].mxu0 %vm95_vm1, %v1312_v6 }
0x1e56   :  { %1998 = vmatpush3.bf16.msra.mxu0 %v2459_v45  ;;  %2001 = vmatprep.mubr.msk.bf16.mxu0 %vm2185_vm0, %v2184_v1 }
0x1e57   :  { %1999 = vmatprep.subr.bf16.mxu0 %v2184_v1 }
0x1e5a   :  { %2000 = vmatpush3.bf16.msra.mxu0 %v2467_v57 }
0x1f28   :  { %v1350_v12 = vpop.f32.mrb[32].mxu0 }
0x1f29   :  { %v1356_v13 = vadd.f32 %v1350_v12, %v973_v8  ;;  %v1987_v16 = vpop.f32.mrb[33].mxu0 }
0x1f2a   :  { %v1353_v17 = vpop.f32.mrb[34].mxu0  ;;  %v984_v16 = vadd.f32 %v2560_v9, %v2503_v10 }
0x1f2b   :  { %2148 = vtanh.f32 %v1356_v13  ;;  %v1988_v18 = vpop.f32.mrb[35].mxu0  ;;  %v1776_v2 = vmul.f32 -1.442695, %v1356_v13 }
0x1f2d   :  { %2150 = vpow2.f32 %v1776_v2 }
0x1f35   :  { %v2149_v19 = vpop.eup %2148 }
0x1f36   :  { %1366 = vrot.lane.b32.xlu1 %v2149_v19, %s2186_s22 }
0x1f37   :  { %v2151_v20 = vpop.eup %2150 }
0x1f38   :  { %v1360_v21 = vadd.f32 1.0, %v2151_v20 }
0x1f3a   :  { %2152 = vrcp.f32 %v1360_v21 }
0x1f44   :  { %v2153_v30 = vpop.eup %2152 }
0x1f45   :  { %v1364_v23 = vmul.f32 %v2153_v30, %v1301_v58 }
0x1fa8   :  { %v1367_v4 = vpop.permute.xlu1 %1366 }
0x1fa9   :  { %v1369_v62 = vmul.f32 %v2153_v30, %v1367_v4 }
0x1fab   :  { %1371 = vrot.lane.b32.xlu0 %v1369_v62, %s2186_s22 }
0x201d   :  { %v1372_v25 = vpop.permute.xlu0 %1371 }
0x201e   :  { %v1374_v26 = vadd.f32 %v1372_v25, %v1364_v23 }
0x2020   :  { %2154 = vtanh.f32 %v1374_v26 }
0x202a   :  { %v2155_v27 = vpop.eup %2154 }
0x202b   :  { %1377 = vrot.lane.b32.xlu1 %v2155_v27, %s2186_s22 }
0x209d   :  { %v1378_v28 = vpop.permute.xlu1 %1377 }
0x209e   :  { %v1380_v29 = vmul.f32 %v2153_v30, %v1378_v28  ;;  %v2188_v28 = vmov 0.0|0.0  }
0x209f   :  { %2024 = vmatprep.subr.bf16.mxu0 %v2188_v28 }
0x20a0   :  { %v1382_v31 = vpack.c.bf16 %v1380_v29, %v1380_v29  ;;  %v1612_v29 = vld [vmem:[%s2670_s9] sm:$0xff] }
0x20a2   :  { %1384 = vrot.lane.b32.xlu0 %v1382_v31, %s2187_s24  ;;  %v1613_v31 = vld [vmem:[%s2670_s9 + $0x8] sm:$0xff] }
0x2114   :  { %v1385_v32 = vpop.permute.xlu0 %1384 }
0x2115   :  { %1994 = vmatmul.mubr.msk.bf16.vlgmr.msra.gmra.mrb[32].mxu1 %vm95_vm1, %v1385_v32  ;;  %v1614_v32 = vld [vmem:[%s2670_s9 + $0x10] sm:$0xff] }
0x2116   :  { %2006 = vmatpush3.bf16.msra.mxu1 %v2459_v45  ;;  %2009 = vmatprep.mubr.msk.bf16.mxu1 %vm2185_vm0, %v2184_v1 }
0x2117   :  { %2007 = vmatprep.subr.bf16.mxu1 %v2184_v1 }
0x211a   :  { %2008 = vmatpush3.bf16.msra.mxu1 %v2467_v57 }
0x21e8   :  { %v1423_v34 = vpop.f32.mrb[32].mxu1 }
0x21e9   :  { %v1429_v36 = vadd.f32 %v1423_v34, %v976_v33  ;;  %v1995_v37 = vpop.f32.mrb[33].mxu1  ;;  %v2025_v33 = vpack.c.bf16 %v1613_v31, %v1612_v29  ;;  %v1615_v34 = vld [vmem:[%s2670_s9 + $0x18] sm:$0xff] }
0x21ea   :  { %v1426_v38 = vpop.f32.mrb[34].mxu1  ;;  %v2028_v37 = vpack.c.bf16 %v1615_v34, %v1614_v32 }
0x21eb   :  { %2156 = vtanh.f32 %v1429_v36  ;;  %v1996_v5 = vpop.f32.mrb[35].mxu1  ;;  %v1778_v45 = vmul.f32 -1.442695, %v1429_v36  ;;  %v19_v38 = vstv %s2671_s10 }
0x21ec   :  { %20 = vst [vmem:[#allocation4] sm:$0x1] %v19_v38 }
0x21ed   :  { %2158 = vpow2.f32 %v1778_v45 }
0x21f5   :  { %v2157_v39 = vpop.eup %2156 }
0x21f6   :  { %1439 = vrot.lane.b32.xlu1 %v2157_v39, %s2186_s22 }
0x21f7   :  { %v2159_v15 = vpop.eup %2158 }
0x21f8   :  { %v1433_v40 = vadd.f32 1.0, %v2159_v15 }
0x21fa   :  { %2160 = vrcp.f32 %v1433_v40 }
0x2204   :  { %v2161_v41 = vpop.eup %2160 }
0x2205   :  { %v1437_v61 = vmul.f32 %v2161_v41, %v1374_v26 }
0x2268   :  { %v1440_v42 = vpop.permute.xlu1 %1439 }
0x2269   :  { %v1442_v57 = vmul.f32 %v2161_v41, %v1440_v42 }
0x226b   :  { %1444 = vrot.lane.b32.xlu0 %v1442_v57, %s2186_s22 }
0x22dd   :  { %v1445_v43 = vpop.permute.xlu0 %1444 }
0x22de   :  { %v1447_v44 = vadd.f32 %v1445_v43, %v1437_v61 }
0x22e0   :  { %2162 = vtanh.f32 %v1447_v44 }
0x22ea   :  { %v2163_v59 = vpop.eup %2162 }
0x22eb   :  { %1450 = vrot.lane.b32.xlu1 %v2163_v59, %s2186_s22 }
0x235d   :  { %v1451_v46 = vpop.permute.xlu1 %1450 }
0x235e   :  { %v1453_v49 = vmul.f32 %v2161_v41, %v1451_v46 }
0x2360   :  { %v1455_v47 = vpack.c.bf16 %v1453_v49, %v1453_v49 }
0x2362   :  { %1457 = vrot.lane.b32.xlu0 %v1455_v47, %s2187_s24 }
0x23d4   :  { %v1458_v50 = vpop.permute.xlu0 %1457 }
0x23d5   :  { %2002 = vmatmul.mubr.msk.bf16.vlgmr.msra.gmra.mrb[36].mxu0 %vm95_vm1, %v1458_v50 }
0x23d6   :  { %2021 = vmatprep.mubr.msk.f32.mxu0 %vm2185_vm0, %v2184_v1  ;;  %2026 = vmatpush3.bf16.msra.mxu0 %v2025_v33 }
0x23d7   :  { %2027 = vmatprep.subr.bf16.mxu0 %v2188_v28 }
0x23da   :  { %2029 = vmatpush3.bf16.msra.mxu0 %v2028_v37 }
0x24a8   :  { %v1496_v24 = vpop.f32.mrb[36].mxu0 }
0x24a9   :  { %v1502_v51 = vadd.f32 %v1496_v24, %v981_v35  ;;  %v2003_v52 = vpop.f32.mrb[37].mxu0 }
0x24aa   :  { %v1499_v54 = vpop.f32.mrb[38].mxu0 }
0x24ab   :  { %2164 = vtanh.f32 %v1502_v51  ;;  %v2004_v55 = vpop.f32.mrb[39].mxu0  ;;  %v1780_v11 = vmul.f32 -1.442695, %v1502_v51 }
0x24ad   :  { %2166 = vpow2.f32 %v1780_v11 }
0x24b5   :  { %v2165_v56 = vpop.eup %2164 }
0x24b6   :  { %1512 = vrot.lane.b32.xlu1 %v2165_v56, %s2186_s22 }
0x24b7   :  { %v2167_v7 = vpop.eup %2166 }
0x24b8   :  { %v1506_v53 = vadd.f32 1.0, %v2167_v7 }
0x24ba   :  { %2168 = vrcp.f32 %v1506_v53 }
0x24c4   :  { %v2169_v58 = vpop.eup %2168 }
0x24c5   :  { %v1510_v22 = vmul.f32 %v2169_v58, %v1447_v44 }
0x2528   :  { %v1513_v63 = vpop.permute.xlu1 %1512 }
0x2529   :  { %v1515_v1 = vmul.f32 %v2169_v58, %v1513_v63 }
0x252b   :  { %1517 = vrot.lane.b32.xlu0 %v1515_v1, %s2186_s22 }
0x259d   :  { %v1518_v0 = vpop.permute.xlu0 %1517 }
0x259e   :  { %v1520_v60 = vadd.f32 %v1518_v0, %v1510_v22 }
0x25a0   :  { %2170 = vtanh.f32 %v1520_v60 }
0x25aa   :  { %v2171_v3 = vpop.eup %2170 }
0x25ab   :  { %1523 = vrot.lane.b32.xlu1 %v2171_v3, %s2186_s22 }
0x261d   :  { %v1524_v6 = vpop.permute.xlu1 %1523 }
0x261e   :  { %v1526_v8 = vmul.f32 %v2169_v58, %v1524_v6 }
0x2620   :  { %v1528_v12 = vpack.c.bf16 %v1526_v8, %v1526_v8 }
0x2622   :  { %1530 = vrot.lane.b32.xlu0 %v1528_v12, %s2187_s24 }
0x2694   :  { %v1531_v13 = vpop.permute.xlu0 %1530 }
0x2695   :  { %2010 = vmatmul.mubr.msk.bf16.vlgmr.msra.gmra.mrb[36].mxu1 %vm95_vm1, %v1531_v13 }
0x2768   :  { %v1569_v17 = vpop.f32.mrb[36].mxu1 }
0x2769   :  { %v1575_v18 = vadd.f32 %v1569_v17, %v984_v16  ;;  %v2011_v19 = vpop.f32.mrb[37].mxu1 }
0x276a   :  { %v1572_v2 = vpop.f32.mrb[38].mxu1 }
0x276b   :  { %2172 = vtanh.f32 %v1575_v18  ;;  %v2012_v20 = vpop.f32.mrb[39].mxu1  ;;  %v1782_v30 = vmul.f32 -1.442695, %v1575_v18 }
0x276d   :  { %2174 = vpow2.f32 %v1782_v30 }
0x2775   :  { %v2173_v21 = vpop.eup %2172 }
0x2776   :  { %1585 = vrot.lane.b32.xlu1 %v2173_v21, %s2186_s22 }
0x2777   :  { %v2175_v4 = vpop.eup %2174 }
0x2778   :  { %v1579_v62 = vadd.f32 1.0, %v2175_v4 }
0x277a   :  { %2176 = vrcp.f32 %v1579_v62 }
0x2784   :  { %v2177_v23 = vpop.eup %2176 }
0x2785   :  { %v1583_v10 = vmul.f32 %v2177_v23, %v1520_v60 }
0x27e8   :  { %v1586_v25 = vpop.permute.xlu1 %1585 }
0x27e9   :  { %v1588_v26 = vmul.f32 %v2177_v23, %v1586_v25 }
0x27eb   :  { %1590 = vrot.lane.b32.xlu0 %v1588_v26, %s2186_s22 }
0x285d   :  { %v1591_v9 = vpop.permute.xlu0 %1590 }
0x285e   :  { %v1593_v27 = vadd.f32 %v1591_v9, %v1583_v10 }
0x2860   :  { %2178 = vtanh.f32 %v1593_v27 }
0x286a   :  { %v2179_v36 = vpop.eup %2178 }
0x286b   :  { %1596 = vrot.lane.b32.xlu1 %v2179_v36, %s2186_s22 }
0x286f   :  { %850 = vrot.lane.b32.xlu1 %v2535_v14, %s2187_s24 }
0x2873   :  { %1607 = vrot.lane.b32.xlu1 %v1593_v27, %s2189_s27 }
0x28dd   :  { %v1597_v5 = vpop.permute.xlu1 %1596 }
0x28de   :  { %v1599_v39 = vmul.f32 %v2177_v23, %v1597_v5 }
0x28e0   :  { %1601 = vrot.lane.b32.xlu0 %v1599_v39, %s2187_s24 }
0x28e1   :  { %v851_v45 = vpop.permute.xlu1 %850 }
0x28e2   :  { %853 = vst.msk [vmem:[%s2672_s12] sm:$0xff] %vm95_vm1, %v851_v45 }
0x28e4   :  { %855 = vrot.lane.b32.xlu0 %v2517_v48, %s2189_s27  ;;  %v1785_v48 = vld [vmem:[#allocation4] ss:$0 sm:$0xff] }
0x28e5   :  { %v1608_v14 = vpop.permute.xlu1 %1607 }
0x28e6   :  { %1784 = vst.msk [vmem:[%s2673_s13 + $0x8] sm:$0xff] %vm95_vm1, %v1608_v14 }
0x2952   :  { %v1602_v15 = vpop.permute.xlu0 %1601 }
0x2953   :  { %1783 = vst.msk [vmem:[%s2672_s12 + $0x8] sm:$0xff] %vm95_vm1, %v1602_v15  ;;  %2022 = vmatmul.mubr.msk.f32.vlgmr.msra.gmra.mrb[40].mxu0 %vm95_vm1, %v1602_v15 }
0x2956   :  { %v856_v40 = vpop.permute.xlu0 %855 }
0x2957   :  { %858 = vst.msk [vmem:[%s2673_s13] sm:$0xff] %vm95_vm1, %v856_v40 }
0x2a26   :  { %v1691_v41 = vpop.f32.mrb[40].mxu0 }
0x2a27   :  { %v1692_v42 = vadd.f32 %v1785_v48, %v1691_v41  ;;  %v2023_v57 = vpop.f32.mrb[41].mxu0 }
0x2a29   :  { %v1787_v61 = vmul.f32 -1.442695, %v1692_v42 }
0x2a2b   :  { %2180 = vpow2.f32 %v1787_v61 }
0x2a35   :  { %v2181_v43 = vpop.eup %2180 }
0x2a36   :  { %v1698_v44 = vadd.f32 1.0, %v2181_v43 }
0x2a38   :  { %2182 = vrcp.f32 %v1698_v44 }
0x2a42   :  { %v2183_v59 = vpop.eup %2182 }
0x2a43   :  { %1702 = vst.msk [vmem:[%s2674_s11] sm:$0xff] %vm1701_vm3, %v2183_v59 }

</bundles_post_ra>
